<compile_context>
chip_gen: v7x
topology: tpu7x:2x2x1
jax: 0.10.0
libtpu: 0.0.40
codegen_flags: <defaults>
</compile_context>

<pallas_src>
import math

import jax
import jax.numpy as jnp
from jax.experimental import pallas as pl
from jax.experimental.pallas import tpu as pltpu

# ----------------------------- model hyperparams -----------------------------
VOCAB = 64
VPAD = 128            # vocab padded to a full 128-lane width for lane-dense stores
D_MODEL = 32          # == embed_dim (weight tying requirement)
N_HEADS = 4
HEAD_DIM = D_MODEL // N_HEADS
N_BLOCKS = 2
MAX_SEQ_LEN = 16
FFN_DIM = 4 * D_MODEL
LN_EPS = 1e-5
NEG_INF = -1e30
MM_DTYPE = jnp.bfloat16   # matmul-operand dtype (f32 accumulation everywhere)


# ------------------------------ shared math utils ------------------------------
def _layernorm(x, gamma, beta):
    """f32 LayerNorm over the last axis (works on (S,D) in-kernel and (B,S,D) ref)."""
    mu = jnp.mean(x, axis=-1, keepdims=True)
    var = jnp.mean((x - mu) ** 2, axis=-1, keepdims=True)
    return (x - mu) * jax.lax.rsqrt(var + LN_EPS) * gamma + beta


def _transformer_block(x, mask, wqkv, bqkv, wo, bo, g1, be1, g2, be2, w1, b1, w2, b2):
    """Pre-LN causal MHSA + ReLU FFN on one batch element's (S, D) slab (in-kernel)."""
    # --- multi-head causal self-attention (pre-LN) ---
    h = _layernorm(x, g1, be1)
    # fused QKV matmul; 1/sqrt(HEAD_DIM) already folded into the Q columns of wqkv
    qkv = jnp.dot(h.astype(MM_DTYPE), wqkv,
                  preferred_element_type=jnp.float32) + bqkv              # (S, 3D) f32

    attn = None
    for hd in range(N_HEADS):                      # static loop over heads
        q0 = hd * HEAD_DIM
        k0 = D_MODEL + q0
        v0 = 2 * D_MODEL + q0
        qh = qkv[:, q0:q0 + HEAD_DIM].astype(MM_DTYPE)
        kh = qkv[:, k0:k0 + HEAD_DIM].astype(MM_DTYPE)
        vh = qkv[:, v0:v0 + HEAD_DIM].astype(MM_DTYPE)
        s = jax.lax.dot_general(qh, kh, (((1,), (1,)), ((), ())),
                                preferred_element_type=jnp.float32)       # (S, S) f32
        s = s + mask
        s = s - jnp.max(s, axis=-1, keepdims=True)
        p = jnp.exp(s)
        p = p / jnp.sum(p, axis=-1, keepdims=True)                        # exact softmax
        oh = jnp.dot(p.astype(MM_DTYPE), vh,
                     preferred_element_type=jnp.float32)                  # (S, hd) f32
        # fold the head concat into the output projection (rows of Wo for this head)
        contrib = jnp.dot(oh.astype(MM_DTYPE), wo[q0:q0 + HEAD_DIM, :],
                          preferred_element_type=jnp.float32)             # (S, D) f32
        attn = contrib if attn is None else attn + contrib
    x = x + attn + bo                                                     # residual (f32)

    # --- position-wise FFN (pre-LN) ---
    h2 = _layernorm(x, g2, be2)
    ff = jnp.dot(h2.astype(MM_DTYPE), w1, preferred_element_type=jnp.float32) + b1
    ff = jnp.maximum(ff, 0.0)
    return x + jnp.dot(ff.astype(MM_DTYPE), w2, preferred_element_type=jnp.float32) + b2


# ---------------------------- fused forward kernel ----------------------------
def slm_fused_kernel(tok_ref, pe_ref, emb_ref, embT_ref, bov_ref,
                     wqkv_ref, bqkv_ref, wo_ref, bo_ref,
                     g1_ref, be1_ref, g2_ref, be2_ref,
                     w1_ref, b1_ref, w2_ref, b2_ref,
                     out_ref):
    S = tok_ref.shape[1]
    tok = tok_ref[0]                                         # (S, 1) int32
    emb = emb_ref[...]                                       # (VPAD, D) f32, pad rows 0

    # embedding gather as an exact one-hot matmul, plus PE add (PE passed once as (S,D))
    col = jax.lax.broadcasted_iota(jnp.int32, (S, VPAD), 1)
    onehot = (col == tok).astype(jnp.float32)                # (S, VPAD)
    x = jnp.dot(onehot, emb, preferred_element_type=jnp.float32) + pe_ref[...]

    # causal additive bias synthesized in-kernel (pure VPU iota+compare, no HBM array)
    r = jax.lax.broadcasted_iota(jnp.int32, (S, S), 0)
    c = jax.lax.broadcasted_iota(jnp.int32, (S, S), 1)
    mask = jnp.where(r >= c, 0.0, NEG_INF)

    for i in range(N_BLOCKS):                                # static loop over blocks
        x = _transformer_block(
            x, mask,
            wqkv_ref[i], bqkv_ref[i], wo_ref[i], bo_ref[i],
            g1_ref[i], be1_ref[i], g2_ref[i], be2_ref[i],
            w1_ref[i], b1_ref[i], w2_ref[i], b2_ref[i])

    # tied output projection on the pre-transposed embedding: lane-dense (S, 128) store
    logits = jnp.dot(x.astype(MM_DTYPE), embT_ref[...],
                     preferred_element_type=jnp.float32) + bov_ref[...]
    out_ref[0] = logits


def _bcast_spec(a):
    """Full-array BlockSpec, same block for every batch grid step."""
    zeros = (0,) * a.ndim
    return pl.BlockSpec(a.shape, lambda b, z=zeros: z)


def _prepare(params, S):
    """Wrapper-side (XLA) preprocessing of raw module-style params: padding, transpose,
    attention-scale folding, bf16 casts of matmul weights."""
    emb = params["emb"]                                              # (VOCAB, D) f32
    emb_pad = jnp.zeros((VPAD, D_MODEL), jnp.float32).at[:VOCAB].set(emb)
    emb_T_mm = emb_pad.T.astype(MM_DTYPE)                            # (D, VPAD)
    b_out_pad = jnp.zeros((1, VPAD), jnp.float32).at[:, :VOCAB].set(params["b_out"])

    scale = 1.0 / math.sqrt(HEAD_DIM)
    wqkv = params["wqkv"].at[:, :, :D_MODEL].multiply(scale)         # fold scale into Q
    bqkv = params["bqkv"].at[:, :, :D_MODEL].multiply(scale)

    return {
        "pe": params["pe"][:S],
        "emb_pad": emb_pad, "emb_T_mm": emb_T_mm, "b_out_pad": b_out_pad,
        "wqkv_mm": wqkv.astype(MM_DTYPE), "bqkv": bqkv,
        "wo_mm": params["wo"].astype(MM_DTYPE), "bo": params["bo"],
        "g1": params["g1"], "be1": params["be1"],
        "g2": params["g2"], "be2": params["be2"],
        "w1_mm": params["w1"].astype(MM_DTYPE), "b1": params["b1"],
        "w2_mm": params["w2"].astype(MM_DTYPE), "b2": params["b2"],
    }


@jax.jit
def slm_forward(tokens, params):
    """tokens: (B, S) int32 -> logits (B, S, VOCAB) float32."""
    B, S = tokens.shape
    assert S <= MAX_SEQ_LEN, f"seq_len {S} exceeds max_seq_len {MAX_SEQ_LEN}"
    prep = _prepare(params, S)
    tok3d = tokens.reshape(B, S, 1).astype(jnp.int32)

    args = (tok3d, prep["pe"], prep["emb_pad"], prep["emb_T_mm"], prep["b_out_pad"],
            prep["wqkv_mm"], prep["bqkv"], prep["wo_mm"], prep["bo"],
            prep["g1"], prep["be1"], prep["g2"], prep["be2"],
            prep["w1_mm"], prep["b1"], prep["w2_mm"], prep["b2"])

    in_specs = [pl.BlockSpec((1, S, 1), lambda b: (b, 0, 0))]        # per-batch tokens
    in_specs += [_bcast_spec(a) for a in args[1:]]                   # weights / PE / emb

    logits_pad = pl.pallas_call(
        slm_fused_kernel,
        out_shape=jax.ShapeDtypeStruct((B, S, VPAD), jnp.float32),
        grid=(B,),
        in_specs=in_specs,
        out_specs=pl.BlockSpec((1, S, VPAD), lambda b: (b, 0, 0)),
        compiler_params=pltpu.CompilerParams(
            dimension_semantics=("parallel",)),                      # megacore on v7x
    )(*args)
    return logits_pad[:, :, :VOCAB]


# ------------------------------- parameter init -------------------------------
def _xavier_normal(key, fan_in, fan_out):
    std = math.sqrt(2.0 / (fan_in + fan_out))
    return jax.random.normal(key, (fan_in, fan_out), jnp.float32) * std


def sinusoidal_pe(max_len, d):
    pos = jnp.arange(max_len, dtype=jnp.float32)[:, None]
    i = jnp.arange(0, d, 2, dtype=jnp.float32)[None, :]
    div = jnp.exp(-(jnp.log(10000.0)) * i / d)
    pe = jnp.zeros((max_len, d), jnp.float32)
    pe = pe.at[:, 0::2].set(jnp.sin(pos * div))
    pe = pe.at[:, 1::2].set(jnp.cos(pos * div))
    return pe


def init_params(key):
    keys = jax.random.split(key, 1 + N_BLOCKS)
    # tied embedding / output weight (V, D); xavier-normal like the reference's final
    # init state (the Linear xavier init overwrites the embedding's normal_ init).
    emb = _xavier_normal(keys[0], VOCAB, D_MODEL)

    wqkv, wo, w1, w2 = [], [], [], []
    for i in range(N_BLOCKS):
        bk = jax.random.split(keys[1 + i], 6)
        wq = _xavier_normal(bk[0], D_MODEL, D_MODEL)
        wk = _xavier_normal(bk[1], D_MODEL, D_MODEL)
        wv = _xavier_normal(bk[2], D_MODEL, D_MODEL)
        wqkv.append(jnp.concatenate([wq, wk, wv], axis=1))           # fused (D, 3D)
        wo.append(_xavier_normal(bk[3], D_MODEL, D_MODEL))
        w1.append(_xavier_normal(bk[4], D_MODEL, FFN_DIM))
        w2.append(_xavier_normal(bk[5], FFN_DIM, D_MODEL))

    z = lambda *s: jnp.zeros(s, jnp.float32)
    o = lambda *s: jnp.ones(s, jnp.float32)
    return {
        "emb": emb,
        "b_out": z(1, VOCAB),
        "pe": sinusoidal_pe(MAX_SEQ_LEN, D_MODEL),
        "wqkv": jnp.stack(wqkv), "bqkv": z(N_BLOCKS, 1, 3 * D_MODEL),
        "wo": jnp.stack(wo), "bo": z(N_BLOCKS, 1, D_MODEL),
        "g1": o(N_BLOCKS, 1, D_MODEL), "be1": z(N_BLOCKS, 1, D_MODEL),
        "g2": o(N_BLOCKS, 1, D_MODEL), "be2": z(N_BLOCKS, 1, D_MODEL),
        "w1": jnp.stack(w1), "b1": z(N_BLOCKS, 1, FFN_DIM),
        "w2": jnp.stack(w2), "b2": z(N_BLOCKS, 1, D_MODEL),
    }


# -------------------------- pure-JAX reference check --------------------------
def slm_reference(tokens, params):
    """Conventional batched implementation (gather, where-mask, head concat, full Wo).
    Mirrors the kernel's bf16 cast points so the comparison tolerance can be tight."""
    B, S = tokens.shape
    p = _prepare(params, S)
    x = p["emb_pad"][tokens] + p["pe"][None]                          # (B, S, D) f32
    causal = jnp.where(jnp.tril(jnp.ones((S, S), bool)), 0.0, NEG_INF)
    for i in range(N_BLOCKS):
        h = _layernorm(x, p["g1"][i], p["be1"][i])
        qkv = jnp.einsum("bsd,de->bse", h.astype(MM_DTYPE), p["wqkv_mm"][i],
                         preferred_element_type=jnp.float32) + p["bqkv"][i]
        q, k, v = jnp.split(qkv, 3, axis=-1)
        q = q.reshape(B, S, N_HEADS, HEAD_DIM).astype(MM_DTYPE)
        k = k.reshape(B, S, N_HEADS, HEAD_DIM).astype(MM_DTYPE)
        v = v.reshape(B, S, N_HEADS, HEAD_DIM).astype(MM_DTYPE)
        s = jnp.einsum("bqhd,bkhd->bhqk", q, k,
                       preferred_element_type=jnp.float32) + causal[None, None]
        s = s - s.max(-1, keepdims=True)
        pr = jnp.exp(s)
        pr = pr / pr.sum(-1, keepdims=True)
        a = jnp.einsum("bhqk,bkhd->bqhd", pr.astype(MM_DTYPE), v,
                       preferred_element_type=jnp.float32).reshape(B, S, D_MODEL)
        x = x + jnp.einsum("bsd,de->bse", a.astype(MM_DTYPE), p["wo_mm"][i],
                           preferred_element_type=jnp.float32) + p["bo"][i]
        h2 = _layernorm(x, p["g2"][i], p["be2"][i])
        ff = jnp.einsum("bsd,df->bsf", h2.astype(MM_DTYPE), p["w1_mm"][i],
                        preferred_element_type=jnp.float32) + p["b1"][i]
        ff = jnp.maximum(ff, 0.0)
        x = x + jnp.einsum("bsf,fd->bsd", ff.astype(MM_DTYPE), p["w2_mm"][i],
                           preferred_element_type=jnp.float32) + p["b2"][i]
    logits = jnp.einsum("bsd,dv->bsv", x.astype(MM_DTYPE), p["emb_T_mm"],
                        preferred_element_type=jnp.float32) + p["b_out_pad"]
    return logits[:, :, :VOCAB]


# ----------------------------------- main -------------------------------------
if __name__ == "__main__":
    key = jax.random.PRNGKey(0)
    pkey, tkey = jax.random.split(key)
    params = init_params(pkey)

    B, S = 2, 8
    tokens = jax.random.randint(tkey, (B, S), 0, VOCAB, dtype=jnp.int32)
    # guard: tokens must be valid vocab indices (the one-hot gather would otherwise
    # silently map out-of-range tokens to the zero padding rows)
    assert int(tokens.min()) >= 0 and int(tokens.max()) < VOCAB

    logits = jax.block_until_ready(slm_forward(tokens, params))
    assert logits.shape == (B, S, VOCAB), logits.shape
    assert logits.dtype == jnp.float32
    assert bool(jnp.all(jnp.isfinite(logits)))

    ref = slm_reference(tokens, params)
    max_diff = float(jnp.max(jnp.abs(logits - ref)))
    # tight tolerance: reference mirrors the kernel's bf16 matmul-operand casts, so
    # residual differences are only f32 summation-order effects
    assert max_diff < 2e-2, f"kernel/reference mismatch: {max_diff}"

    print("KERNEL_OK")
</pallas_src>

<mosaic_0001>
module attributes {stable_mosaic.version = 11 : i64} {
  func.func @slm_fused_kernel(%arg0: i32, %arg1: memref<1x8x1xi32, #tpu.memory_space<vmem>>, %arg2: memref<8x32xf32, #tpu.memory_space<vmem>>, %arg3: memref<128x32xf32, #tpu.memory_space<vmem>>, %arg4: memref<32x128xbf16, #tpu.memory_space<vmem>>, %arg5: memref<1x128xf32, #tpu.memory_space<vmem>>, %arg6: memref<2x32x96xbf16, #tpu.memory_space<vmem>>, %arg7: memref<2x1x96xf32, #tpu.memory_space<vmem>>, %arg8: memref<2x32x32xbf16, #tpu.memory_space<vmem>>, %arg9: memref<2x1x32xf32, #tpu.memory_space<vmem>>, %arg10: memref<2x1x32xf32, #tpu.memory_space<vmem>>, %arg11: memref<2x1x32xf32, #tpu.memory_space<vmem>>, %arg12: memref<2x1x32xf32, #tpu.memory_space<vmem>>, %arg13: memref<2x1x32xf32, #tpu.memory_space<vmem>>, %arg14: memref<2x32x128xbf16, #tpu.memory_space<vmem>>, %arg15: memref<2x1x128xf32, #tpu.memory_space<vmem>>, %arg16: memref<2x128x32xbf16, #tpu.memory_space<vmem>>, %arg17: memref<2x1x32xf32, #tpu.memory_space<vmem>>, %arg18: memref<1x8x128xf32, #tpu.memory_space<vmem>>) attributes {dimension_semantics = [#tpu.dimension_semantics<parallel>], iteration_bounds = array<i64: 2>, scalar_prefetch = 0 : i64, scratch_operands = 0 : i64, tpu.core_type = #tpu.core_type<tc>, window_params = [{transform_indices = @transform_0, window_bounds = array<i64: 1, 8, 1>}, {pipeline_mode = #tpu.pipeline_mode<synchronous>, transform_indices = @transform_1, window_bounds = array<i64: 8, 32>}, {pipeline_mode = #tpu.pipeline_mode<synchronous>, transform_indices = @transform_2, window_bounds = array<i64: 128, 32>}, {pipeline_mode = #tpu.pipeline_mode<synchronous>, transform_indices = @transform_3, window_bounds = array<i64: 32, 128>}, {pipeline_mode = #tpu.pipeline_mode<synchronous>, transform_indices = @transform_4, window_bounds = array<i64: 1, 128>}, {pipeline_mode = #tpu.pipeline_mode<synchronous>, transform_indices = @transform_5, window_bounds = array<i64: 2, 32, 96>}, {pipeline_mode = #tpu.pipeline_mode<synchronous>, transform_indices = @transform_6, window_bounds = array<i64: 2, 1, 96>}, {pipeline_mode = #tpu.pipeline_mode<synchronous>, transform_indices = @transform_7, window_bounds = array<i64: 2, 32, 32>}, {pipeline_mode = #tpu.pipeline_mode<synchronous>, transform_indices = @transform_8, window_bounds = array<i64: 2, 1, 32>}, {pipeline_mode = #tpu.pipeline_mode<synchronous>, transform_indices = @transform_9, window_bounds = array<i64: 2, 1, 32>}, {pipeline_mode = #tpu.pipeline_mode<synchronous>, transform_indices = @transform_10, window_bounds = array<i64: 2, 1, 32>}, {pipeline_mode = #tpu.pipeline_mode<synchronous>, transform_indices = @transform_11, window_bounds = array<i64: 2, 1, 32>}, {pipeline_mode = #tpu.pipeline_mode<synchronous>, transform_indices = @transform_12, window_bounds = array<i64: 2, 1, 32>}, {pipeline_mode = #tpu.pipeline_mode<synchronous>, transform_indices = @transform_13, window_bounds = array<i64: 2, 32, 128>}, {pipeline_mode = #tpu.pipeline_mode<synchronous>, transform_indices = @transform_14, window_bounds = array<i64: 2, 1, 128>}, {pipeline_mode = #tpu.pipeline_mode<synchronous>, transform_indices = @transform_15, window_bounds = array<i64: 2, 128, 32>}, {pipeline_mode = #tpu.pipeline_mode<synchronous>, transform_indices = @transform_16, window_bounds = array<i64: 2, 1, 32>}, {transform_indices = @transform_17, window_bounds = array<i64: 1, 8, 128>}]} {
    %c0 = arith.constant 0 : index
    %c0_0 = arith.constant 0 : index
    %c0_1 = arith.constant 0 : index
    %0 = vector.load %arg1[%c0, %c0_0, %c0_1] : memref<1x8x1xi32, #tpu.memory_space<vmem>>, vector<1x8x1xi32>
    %1 = vector.shape_cast %0 : vector<1x8x1xi32> to vector<8x1xi32>
    %c0_2 = arith.constant 0 : index
    %c0_3 = arith.constant 0 : index
    %2 = vector.load %arg3[%c0_2, %c0_3] : memref<128x32xf32, #tpu.memory_space<vmem>>, vector<128x32xf32>
    %3 = tpu.iota {dimensions = array<i32: 1>} : vector<8x128xi32>
    %4 = vector.broadcast %1 : vector<8x1xi32> to vector<8x128xi32>
    %5 = arith.cmpi eq, %3, %4 : vector<8x128xi32>
    %6 = arith.extui %5 : vector<8x128xi1> to vector<8x128xi32>
    %7 = arith.sitofp %6 : vector<8x128xi32> to vector<8x128xf32>
    %cst = arith.constant dense<0.000000e+00> : vector<8x32xf32>
    %8 = tpu.matmul %7, %2, %cst {dimension_numbers = #tpu.dot_dimension_numbers<[1], [0], [0], [1], [0, 0, 1, 1], [], []>} : vector<8x128xf32>, vector<128x32xf32>, vector<8x32xf32> -> vector<8x32xf32>
    %c0_4 = arith.constant 0 : index
    %c0_5 = arith.constant 0 : index
    %9 = vector.load %arg2[%c0_4, %c0_5] : memref<8x32xf32, #tpu.memory_space<vmem>>, vector<8x32xf32>
    %10 = arith.addf %8, %9 : vector<8x32xf32>
    %11 = tpu.iota {dimensions = array<i32: 0>} : vector<8x8xi32>
    %12 = tpu.iota {dimensions = array<i32: 1>} : vector<8x8xi32>
    %13 = arith.cmpi sge, %11, %12 : vector<8x8xi32>
    %cst_6 = arith.constant 0.000000e+00 : f32
    %cst_7 = arith.constant -1.000000e+30 : f32
    %14 = vector.broadcast %cst_6 : f32 to vector<8x8xf32>
    %15 = vector.broadcast %cst_7 : f32 to vector<8x8xf32>
    %16 = arith.select %13, %14, %15 : vector<8x8xi1>, vector<8x8xf32>
    %c0_8 = arith.constant 0 : index
    %c0_9 = arith.constant 0 : index
    %c0_10 = arith.constant 0 : index
    %17 = vector.load %arg6[%c0_8, %c0_9, %c0_10] : memref<2x32x96xbf16, #tpu.memory_space<vmem>>, vector<1x32x96xbf16>
    %18 = vector.shape_cast %17 : vector<1x32x96xbf16> to vector<32x96xbf16>
    %c0_11 = arith.constant 0 : index
    %c0_12 = arith.constant 0 : index
    %c0_13 = arith.constant 0 : index
    %19 = vector.load %arg7[%c0_11, %c0_12, %c0_13] : memref<2x1x96xf32, #tpu.memory_space<vmem>>, vector<1x1x96xf32>
    %20 = vector.shape_cast %19 : vector<1x1x96xf32> to vector<1x96xf32>
    %c0_14 = arith.constant 0 : index
    %c0_15 = arith.constant 0 : index
    %c0_16 = arith.constant 0 : index
    %21 = vector.load %arg8[%c0_14, %c0_15, %c0_16] : memref<2x32x32xbf16, #tpu.memory_space<vmem>>, vector<1x32x32xbf16>
    %22 = vector.shape_cast %21 : vector<1x32x32xbf16> to vector<32x32xbf16>
    %c0_17 = arith.constant 0 : index
    %c0_18 = arith.constant 0 : index
    %c0_19 = arith.constant 0 : index
    %23 = vector.load %arg9[%c0_17, %c0_18, %c0_19] : memref<2x1x32xf32, #tpu.memory_space<vmem>>, vector<1x1x32xf32>
    %24 = vector.shape_cast %23 : vector<1x1x32xf32> to vector<1x32xf32>
    %c0_20 = arith.constant 0 : index
    %c0_21 = arith.constant 0 : index
    %c0_22 = arith.constant 0 : index
    %25 = vector.load %arg10[%c0_20, %c0_21, %c0_22] : memref<2x1x32xf32, #tpu.memory_space<vmem>>, vector<1x1x32xf32>
    %26 = vector.shape_cast %25 : vector<1x1x32xf32> to vector<1x32xf32>
    %c0_23 = arith.constant 0 : index
    %c0_24 = arith.constant 0 : index
    %c0_25 = arith.constant 0 : index
    %27 = vector.load %arg11[%c0_23, %c0_24, %c0_25] : memref<2x1x32xf32, #tpu.memory_space<vmem>>, vector<1x1x32xf32>
    %28 = vector.shape_cast %27 : vector<1x1x32xf32> to vector<1x32xf32>
    %c0_26 = arith.constant 0 : index
    %c0_27 = arith.constant 0 : index
    %c0_28 = arith.constant 0 : index
    %29 = vector.load %arg12[%c0_26, %c0_27, %c0_28] : memref<2x1x32xf32, #tpu.memory_space<vmem>>, vector<1x1x32xf32>
    %30 = vector.shape_cast %29 : vector<1x1x32xf32> to vector<1x32xf32>
    %c0_29 = arith.constant 0 : index
    %c0_30 = arith.constant 0 : index
    %c0_31 = arith.constant 0 : index
    %31 = vector.load %arg13[%c0_29, %c0_30, %c0_31] : memref<2x1x32xf32, #tpu.memory_space<vmem>>, vector<1x1x32xf32>
    %32 = vector.shape_cast %31 : vector<1x1x32xf32> to vector<1x32xf32>
    %c0_32 = arith.constant 0 : index
    %c0_33 = arith.constant 0 : index
    %c0_34 = arith.constant 0 : index
    %33 = vector.load %arg14[%c0_32, %c0_33, %c0_34] : memref<2x32x128xbf16, #tpu.memory_space<vmem>>, vector<1x32x128xbf16>
    %34 = vector.shape_cast %33 : vector<1x32x128xbf16> to vector<32x128xbf16>
    %c0_35 = arith.constant 0 : index
    %c0_36 = arith.constant 0 : index
    %c0_37 = arith.constant 0 : index
    %35 = vector.load %arg15[%c0_35, %c0_36, %c0_37] : memref<2x1x128xf32, #tpu.memory_space<vmem>>, vector<1x1x128xf32>
    %36 = vector.shape_cast %35 : vector<1x1x128xf32> to vector<1x128xf32>
    %c0_38 = arith.constant 0 : index
    %c0_39 = arith.constant 0 : index
    %c0_40 = arith.constant 0 : index
    %37 = vector.load %arg16[%c0_38, %c0_39, %c0_40] : memref<2x128x32xbf16, #tpu.memory_space<vmem>>, vector<1x128x32xbf16>
    %38 = vector.shape_cast %37 : vector<1x128x32xbf16> to vector<128x32xbf16>
    %c0_41 = arith.constant 0 : index
    %c0_42 = arith.constant 0 : index
    %c0_43 = arith.constant 0 : index
    %39 = vector.load %arg17[%c0_41, %c0_42, %c0_43] : memref<2x1x32xf32, #tpu.memory_space<vmem>>, vector<1x1x32xf32>
    %40 = vector.shape_cast %39 : vector<1x1x32xf32> to vector<1x32xf32>
    %cst_44 = arith.constant dense<0.000000e+00> : vector<8xf32>
    %41 = vector.multi_reduction <add>, %10, %cst_44 [1] : vector<8x32xf32> to vector<8xf32>
    %42 = vector.shape_cast %41 : vector<8xf32> to vector<8x1xf32>
    %cst_45 = arith.constant 3.200000e+01 : f32
    %43 = vector.broadcast %cst_45 : f32 to vector<8x1xf32>
    %44 = arith.divf %42, %43 : vector<8x1xf32>
    %45 = vector.broadcast %44 : vector<8x1xf32> to vector<8x32xf32>
    %46 = arith.subf %10, %45 : vector<8x32xf32>
    %47 = arith.mulf %46, %46 : vector<8x32xf32>
    %cst_46 = arith.constant dense<0.000000e+00> : vector<8xf32>
    %48 = vector.multi_reduction <add>, %47, %cst_46 [1] : vector<8x32xf32> to vector<8xf32>
    %49 = vector.shape_cast %48 : vector<8xf32> to vector<8x1xf32>
    %cst_47 = arith.constant 3.200000e+01 : f32
    %50 = vector.broadcast %cst_47 : f32 to vector<8x1xf32>
    %51 = arith.divf %49, %50 : vector<8x1xf32>
    %52 = vector.broadcast %44 : vector<8x1xf32> to vector<8x32xf32>
    %53 = arith.subf %10, %52 : vector<8x32xf32>
    %cst_48 = arith.constant 9.99999974E-6 : f32
    %54 = vector.broadcast %cst_48 : f32 to vector<8x1xf32>
    %55 = arith.addf %51, %54 : vector<8x1xf32>
    %56 = math.rsqrt %55 : vector<8x1xf32>
    %57 = vector.broadcast %56 : vector<8x1xf32> to vector<8x32xf32>
    %58 = arith.mulf %53, %57 : vector<8x32xf32>
    %59 = vector.broadcast %26 : vector<1x32xf32> to vector<8x32xf32>
    %60 = arith.mulf %58, %59 : vector<8x32xf32>
    %61 = vector.broadcast %28 : vector<1x32xf32> to vector<8x32xf32>
    %62 = arith.addf %60, %61 : vector<8x32xf32>
    %63 = arith.truncf %62 : vector<8x32xf32> to vector<8x32xbf16>
    %cst_49 = arith.constant dense<0.000000e+00> : vector<8x96xf32>
    %64 = tpu.matmul %63, %18, %cst_49 {dimension_numbers = #tpu.dot_dimension_numbers<[1], [0], [0], [1], [0, 0, 1, 1], [], []>} : vector<8x32xbf16>, vector<32x96xbf16>, vector<8x96xf32> -> vector<8x96xf32>
    %65 = vector.broadcast %20 : vector<1x96xf32> to vector<8x96xf32>
    %66 = arith.addf %64, %65 : vector<8x96xf32>
    %67 = vector.extract_strided_slice %66 {offsets = [0, 0], sizes = [8, 8], strides = [1, 1]} : vector<8x96xf32> to vector<8x8xf32>
    %68 = arith.truncf %67 : vector<8x8xf32> to vector<8x8xbf16>
    %69 = vector.extract_strided_slice %66 {offsets = [0, 32], sizes = [8, 8], strides = [1, 1]} : vector<8x96xf32> to vector<8x8xf32>
    %70 = arith.truncf %69 : vector<8x8xf32> to vector<8x8xbf16>
    %71 = vector.extract_strided_slice %66 {offsets = [0, 64], sizes = [8, 8], strides = [1, 1]} : vector<8x96xf32> to vector<8x8xf32>
    %72 = arith.truncf %71 : vector<8x8xf32> to vector<8x8xbf16>
    %cst_50 = arith.constant dense<0.000000e+00> : vector<8x8xf32>
    %73 = tpu.matmul %68, %70, %cst_50 {dimension_numbers = #tpu.dot_dimension_numbers<[1], [1], [0], [0], [0, 0, 1, 0], [], []>} : vector<8x8xbf16>, vector<8x8xbf16>, vector<8x8xf32> -> vector<8x8xf32>
    %74 = arith.addf %73, %16 : vector<8x8xf32>
    %cst_51 = arith.constant dense<0xFF800000> : vector<8xf32>
    %75 = vector.multi_reduction <maximumf>, %74, %cst_51 [1] : vector<8x8xf32> to vector<8xf32>
    %76 = vector.shape_cast %75 : vector<8xf32> to vector<8x1xf32>
    %77 = vector.broadcast %76 : vector<8x1xf32> to vector<8x8xf32>
    %78 = arith.subf %74, %77 : vector<8x8xf32>
    %79 = math.exp %78 : vector<8x8xf32>
    %cst_52 = arith.constant dense<0.000000e+00> : vector<8xf32>
    %80 = vector.multi_reduction <add>, %79, %cst_52 [1] : vector<8x8xf32> to vector<8xf32>
    %81 = vector.shape_cast %80 : vector<8xf32> to vector<8x1xf32>
    %82 = vector.broadcast %81 : vector<8x1xf32> to vector<8x8xf32>
    %83 = arith.divf %79, %82 : vector<8x8xf32>
    %84 = arith.truncf %83 : vector<8x8xf32> to vector<8x8xbf16>
    %cst_53 = arith.constant dense<0.000000e+00> : vector<8x8xf32>
    %85 = tpu.matmul %84, %72, %cst_53 {dimension_numbers = #tpu.dot_dimension_numbers<[1], [0], [0], [1], [0, 0, 1, 1], [], []>} : vector<8x8xbf16>, vector<8x8xbf16>, vector<8x8xf32> -> vector<8x8xf32>
    %86 = arith.truncf %85 : vector<8x8xf32> to vector<8x8xbf16>
    %87 = vector.extract_strided_slice %22 {offsets = [0, 0], sizes = [8, 32], strides = [1, 1]} : vector<32x32xbf16> to vector<8x32xbf16>
    %cst_54 = arith.constant dense<0.000000e+00> : vector<8x32xf32>
    %88 = tpu.matmul %86, %87, %cst_54 {dimension_numbers = #tpu.dot_dimension_numbers<[1], [0], [0], [1], [0, 0, 1, 1], [], []>} : vector<8x8xbf16>, vector<8x32xbf16>, vector<8x32xf32> -> vector<8x32xf32>
    %89 = vector.extract_strided_slice %66 {offsets = [0, 8], sizes = [8, 8], strides = [1, 1]} : vector<8x96xf32> to vector<8x8xf32>
    %90 = arith.truncf %89 : vector<8x8xf32> to vector<8x8xbf16>
    %91 = vector.extract_strided_slice %66 {offsets = [0, 40], sizes = [8, 8], strides = [1, 1]} : vector<8x96xf32> to vector<8x8xf32>
    %92 = arith.truncf %91 : vector<8x8xf32> to vector<8x8xbf16>
    %93 = vector.extract_strided_slice %66 {offsets = [0, 72], sizes = [8, 8], strides = [1, 1]} : vector<8x96xf32> to vector<8x8xf32>
    %94 = arith.truncf %93 : vector<8x8xf32> to vector<8x8xbf16>
    %cst_55 = arith.constant dense<0.000000e+00> : vector<8x8xf32>
    %95 = tpu.matmul %90, %92, %cst_55 {dimension_numbers = #tpu.dot_dimension_numbers<[1], [1], [0], [0], [0, 0, 1, 0], [], []>} : vector<8x8xbf16>, vector<8x8xbf16>, vector<8x8xf32> -> vector<8x8xf32>
    %96 = arith.addf %95, %16 : vector<8x8xf32>
    %cst_56 = arith.constant dense<0xFF800000> : vector<8xf32>
    %97 = vector.multi_reduction <maximumf>, %96, %cst_56 [1] : vector<8x8xf32> to vector<8xf32>
    %98 = vector.shape_cast %97 : vector<8xf32> to vector<8x1xf32>
    %99 = vector.broadcast %98 : vector<8x1xf32> to vector<8x8xf32>
    %100 = arith.subf %96, %99 : vector<8x8xf32>
    %101 = math.exp %100 : vector<8x8xf32>
    %cst_57 = arith.constant dense<0.000000e+00> : vector<8xf32>
    %102 = vector.multi_reduction <add>, %101, %cst_57 [1] : vector<8x8xf32> to vector<8xf32>
    %103 = vector.shape_cast %102 : vector<8xf32> to vector<8x1xf32>
    %104 = vector.broadcast %103 : vector<8x1xf32> to vector<8x8xf32>
    %105 = arith.divf %101, %104 : vector<8x8xf32>
    %106 = arith.truncf %105 : vector<8x8xf32> to vector<8x8xbf16>
    %cst_58 = arith.constant dense<0.000000e+00> : vector<8x8xf32>
    %107 = tpu.matmul %106, %94, %cst_58 {dimension_numbers = #tpu.dot_dimension_numbers<[1], [0], [0], [1], [0, 0, 1, 1], [], []>} : vector<8x8xbf16>, vector<8x8xbf16>, vector<8x8xf32> -> vector<8x8xf32>
    %108 = arith.truncf %107 : vector<8x8xf32> to vector<8x8xbf16>
    %109 = vector.extract_strided_slice %22 {offsets = [8, 0], sizes = [8, 32], strides = [1, 1]} : vector<32x32xbf16> to vector<8x32xbf16>
    %cst_59 = arith.constant dense<0.000000e+00> : vector<8x32xf32>
    %110 = tpu.matmul %108, %109, %cst_59 {dimension_numbers = #tpu.dot_dimension_numbers<[1], [0], [0], [1], [0, 0, 1, 1], [], []>} : vector<8x8xbf16>, vector<8x32xbf16>, vector<8x32xf32> -> vector<8x32xf32>
    %111 = arith.addf %88, %110 : vector<8x32xf32>
    %112 = vector.extract_strided_slice %66 {offsets = [0, 16], sizes = [8, 8], strides = [1, 1]} : vector<8x96xf32> to vector<8x8xf32>
    %113 = arith.truncf %112 : vector<8x8xf32> to vector<8x8xbf16>
    %114 = vector.extract_strided_slice %66 {offsets = [0, 48], sizes = [8, 8], strides = [1, 1]} : vector<8x96xf32> to vector<8x8xf32>
    %115 = arith.truncf %114 : vector<8x8xf32> to vector<8x8xbf16>
    %116 = vector.extract_strided_slice %66 {offsets = [0, 80], sizes = [8, 8], strides = [1, 1]} : vector<8x96xf32> to vector<8x8xf32>
    %117 = arith.truncf %116 : vector<8x8xf32> to vector<8x8xbf16>
    %cst_60 = arith.constant dense<0.000000e+00> : vector<8x8xf32>
    %118 = tpu.matmul %113, %115, %cst_60 {dimension_numbers = #tpu.dot_dimension_numbers<[1], [1], [0], [0], [0, 0, 1, 0], [], []>} : vector<8x8xbf16>, vector<8x8xbf16>, vector<8x8xf32> -> vector<8x8xf32>
    %119 = arith.addf %118, %16 : vector<8x8xf32>
    %cst_61 = arith.constant dense<0xFF800000> : vector<8xf32>
    %120 = vector.multi_reduction <maximumf>, %119, %cst_61 [1] : vector<8x8xf32> to vector<8xf32>
    %121 = vector.shape_cast %120 : vector<8xf32> to vector<8x1xf32>
    %122 = vector.broadcast %121 : vector<8x1xf32> to vector<8x8xf32>
    %123 = arith.subf %119, %122 : vector<8x8xf32>
    %124 = math.exp %123 : vector<8x8xf32>
    %cst_62 = arith.constant dense<0.000000e+00> : vector<8xf32>
    %125 = vector.multi_reduction <add>, %124, %cst_62 [1] : vector<8x8xf32> to vector<8xf32>
    %126 = vector.shape_cast %125 : vector<8xf32> to vector<8x1xf32>
    %127 = vector.broadcast %126 : vector<8x1xf32> to vector<8x8xf32>
    %128 = arith.divf %124, %127 : vector<8x8xf32>
    %129 = arith.truncf %128 : vector<8x8xf32> to vector<8x8xbf16>
    %cst_63 = arith.constant dense<0.000000e+00> : vector<8x8xf32>
    %130 = tpu.matmul %129, %117, %cst_63 {dimension_numbers = #tpu.dot_dimension_numbers<[1], [0], [0], [1], [0, 0, 1, 1], [], []>} : vector<8x8xbf16>, vector<8x8xbf16>, vector<8x8xf32> -> vector<8x8xf32>
    %131 = arith.truncf %130 : vector<8x8xf32> to vector<8x8xbf16>
    %132 = vector.extract_strided_slice %22 {offsets = [16, 0], sizes = [8, 32], strides = [1, 1]} : vector<32x32xbf16> to vector<8x32xbf16>
    %cst_64 = arith.constant dense<0.000000e+00> : vector<8x32xf32>
    %133 = tpu.matmul %131, %132, %cst_64 {dimension_numbers = #tpu.dot_dimension_numbers<[1], [0], [0], [1], [0, 0, 1, 1], [], []>} : vector<8x8xbf16>, vector<8x32xbf16>, vector<8x32xf32> -> vector<8x32xf32>
    %134 = arith.addf %111, %133 : vector<8x32xf32>
    %135 = vector.extract_strided_slice %66 {offsets = [0, 24], sizes = [8, 8], strides = [1, 1]} : vector<8x96xf32> to vector<8x8xf32>
    %136 = arith.truncf %135 : vector<8x8xf32> to vector<8x8xbf16>
    %137 = vector.extract_strided_slice %66 {offsets = [0, 56], sizes = [8, 8], strides = [1, 1]} : vector<8x96xf32> to vector<8x8xf32>
    %138 = arith.truncf %137 : vector<8x8xf32> to vector<8x8xbf16>
    %139 = vector.extract_strided_slice %66 {offsets = [0, 88], sizes = [8, 8], strides = [1, 1]} : vector<8x96xf32> to vector<8x8xf32>
    %140 = arith.truncf %139 : vector<8x8xf32> to vector<8x8xbf16>
    %cst_65 = arith.constant dense<0.000000e+00> : vector<8x8xf32>
    %141 = tpu.matmul %136, %138, %cst_65 {dimension_numbers = #tpu.dot_dimension_numbers<[1], [1], [0], [0], [0, 0, 1, 0], [], []>} : vector<8x8xbf16>, vector<8x8xbf16>, vector<8x8xf32> -> vector<8x8xf32>
    %142 = arith.addf %141, %16 : vector<8x8xf32>
    %cst_66 = arith.constant dense<0xFF800000> : vector<8xf32>
    %143 = vector.multi_reduction <maximumf>, %142, %cst_66 [1] : vector<8x8xf32> to vector<8xf32>
    %144 = vector.shape_cast %143 : vector<8xf32> to vector<8x1xf32>
    %145 = vector.broadcast %144 : vector<8x1xf32> to vector<8x8xf32>
    %146 = arith.subf %142, %145 : vector<8x8xf32>
    %147 = math.exp %146 : vector<8x8xf32>
    %cst_67 = arith.constant dense<0.000000e+00> : vector<8xf32>
    %148 = vector.multi_reduction <add>, %147, %cst_67 [1] : vector<8x8xf32> to vector<8xf32>
    %149 = vector.shape_cast %148 : vector<8xf32> to vector<8x1xf32>
    %150 = vector.broadcast %149 : vector<8x1xf32> to vector<8x8xf32>
    %151 = arith.divf %147, %150 : vector<8x8xf32>
    %152 = arith.truncf %151 : vector<8x8xf32> to vector<8x8xbf16>
    %cst_68 = arith.constant dense<0.000000e+00> : vector<8x8xf32>
    %153 = tpu.matmul %152, %140, %cst_68 {dimension_numbers = #tpu.dot_dimension_numbers<[1], [0], [0], [1], [0, 0, 1, 1], [], []>} : vector<8x8xbf16>, vector<8x8xbf16>, vector<8x8xf32> -> vector<8x8xf32>
    %154 = arith.truncf %153 : vector<8x8xf32> to vector<8x8xbf16>
    %155 = vector.extract_strided_slice %22 {offsets = [24, 0], sizes = [8, 32], strides = [1, 1]} : vector<32x32xbf16> to vector<8x32xbf16>
    %cst_69 = arith.constant dense<0.000000e+00> : vector<8x32xf32>
    %156 = tpu.matmul %154, %155, %cst_69 {dimension_numbers = #tpu.dot_dimension_numbers<[1], [0], [0], [1], [0, 0, 1, 1], [], []>} : vector<8x8xbf16>, vector<8x32xbf16>, vector<8x32xf32> -> vector<8x32xf32>
    %157 = arith.addf %134, %156 : vector<8x32xf32>
    %158 = arith.addf %10, %157 : vector<8x32xf32>
    %159 = vector.broadcast %24 : vector<1x32xf32> to vector<8x32xf32>
    %160 = arith.addf %158, %159 : vector<8x32xf32>
    %cst_70 = arith.constant dense<0.000000e+00> : vector<8xf32>
    %161 = vector.multi_reduction <add>, %160, %cst_70 [1] : vector<8x32xf32> to vector<8xf32>
    %162 = vector.shape_cast %161 : vector<8xf32> to vector<8x1xf32>
    %cst_71 = arith.constant 3.200000e+01 : f32
    %163 = vector.broadcast %cst_71 : f32 to vector<8x1xf32>
    %164 = arith.divf %162, %163 : vector<8x1xf32>
    %165 = vector.broadcast %164 : vector<8x1xf32> to vector<8x32xf32>
    %166 = arith.subf %160, %165 : vector<8x32xf32>
    %167 = arith.mulf %166, %166 : vector<8x32xf32>
    %cst_72 = arith.constant dense<0.000000e+00> : vector<8xf32>
    %168 = vector.multi_reduction <add>, %167, %cst_72 [1] : vector<8x32xf32> to vector<8xf32>
    %169 = vector.shape_cast %168 : vector<8xf32> to vector<8x1xf32>
    %cst_73 = arith.constant 3.200000e+01 : f32
    %170 = vector.broadcast %cst_73 : f32 to vector<8x1xf32>
    %171 = arith.divf %169, %170 : vector<8x1xf32>
    %172 = vector.broadcast %164 : vector<8x1xf32> to vector<8x32xf32>
    %173 = arith.subf %160, %172 : vector<8x32xf32>
    %cst_74 = arith.constant 9.99999974E-6 : f32
    %174 = vector.broadcast %cst_74 : f32 to vector<8x1xf32>
    %175 = arith.addf %171, %174 : vector<8x1xf32>
    %176 = math.rsqrt %175 : vector<8x1xf32>
    %177 = vector.broadcast %176 : vector<8x1xf32> to vector<8x32xf32>
    %178 = arith.mulf %173, %177 : vector<8x32xf32>
    %179 = vector.broadcast %30 : vector<1x32xf32> to vector<8x32xf32>
    %180 = arith.mulf %178, %179 : vector<8x32xf32>
    %181 = vector.broadcast %32 : vector<1x32xf32> to vector<8x32xf32>
    %182 = arith.addf %180, %181 : vector<8x32xf32>
    %183 = arith.truncf %182 : vector<8x32xf32> to vector<8x32xbf16>
    %cst_75 = arith.constant dense<0.000000e+00> : vector<8x128xf32>
    %184 = tpu.matmul %183, %34, %cst_75 {dimension_numbers = #tpu.dot_dimension_numbers<[1], [0], [0], [1], [0, 0, 1, 1], [], []>} : vector<8x32xbf16>, vector<32x128xbf16>, vector<8x128xf32> -> vector<8x128xf32>
    %185 = vector.broadcast %36 : vector<1x128xf32> to vector<8x128xf32>
    %186 = arith.addf %184, %185 : vector<8x128xf32>
    %cst_76 = arith.constant 0.000000e+00 : f32
    %187 = vector.broadcast %cst_76 : f32 to vector<8x128xf32>
    %188 = arith.maximumf %186, %187 : vector<8x128xf32>
    %189 = arith.truncf %188 : vector<8x128xf32> to vector<8x128xbf16>
    %cst_77 = arith.constant dense<0.000000e+00> : vector<8x32xf32>
    %190 = tpu.matmul %189, %38, %cst_77 {dimension_numbers = #tpu.dot_dimension_numbers<[1], [0], [0], [1], [0, 0, 1, 1], [], []>} : vector<8x128xbf16>, vector<128x32xbf16>, vector<8x32xf32> -> vector<8x32xf32>
    %191 = arith.addf %160, %190 : vector<8x32xf32>
    %192 = vector.broadcast %40 : vector<1x32xf32> to vector<8x32xf32>
    %193 = arith.addf %191, %192 : vector<8x32xf32>
    %c1 = arith.constant 1 : index
    %c0_78 = arith.constant 0 : index
    %c0_79 = arith.constant 0 : index
    %194 = vector.load %arg6[%c1, %c0_78, %c0_79] : memref<2x32x96xbf16, #tpu.memory_space<vmem>>, vector<1x32x96xbf16>
    %195 = vector.shape_cast %194 : vector<1x32x96xbf16> to vector<32x96xbf16>
    %c1_80 = arith.constant 1 : index
    %c0_81 = arith.constant 0 : index
    %c0_82 = arith.constant 0 : index
    %196 = vector.load %arg7[%c1_80, %c0_81, %c0_82] : memref<2x1x96xf32, #tpu.memory_space<vmem>>, vector<1x1x96xf32>
    %197 = vector.shape_cast %196 : vector<1x1x96xf32> to vector<1x96xf32>
    %c1_83 = arith.constant 1 : index
    %c0_84 = arith.constant 0 : index
    %c0_85 = arith.constant 0 : index
    %198 = vector.load %arg8[%c1_83, %c0_84, %c0_85] : memref<2x32x32xbf16, #tpu.memory_space<vmem>>, vector<1x32x32xbf16>
    %199 = vector.shape_cast %198 : vector<1x32x32xbf16> to vector<32x32xbf16>
    %c1_86 = arith.constant 1 : index
    %c0_87 = arith.constant 0 : index
    %c0_88 = arith.constant 0 : index
    %200 = vector.load %arg9[%c1_86, %c0_87, %c0_88] : memref<2x1x32xf32, #tpu.memory_space<vmem>>, vector<1x1x32xf32>
    %201 = vector.shape_cast %200 : vector<1x1x32xf32> to vector<1x32xf32>
    %c1_89 = arith.constant 1 : index
    %c0_90 = arith.constant 0 : index
    %c0_91 = arith.constant 0 : index
    %202 = vector.load %arg10[%c1_89, %c0_90, %c0_91] : memref<2x1x32xf32, #tpu.memory_space<vmem>>, vector<1x1x32xf32>
    %203 = vector.shape_cast %202 : vector<1x1x32xf32> to vector<1x32xf32>
    %c1_92 = arith.constant 1 : index
    %c0_93 = arith.constant 0 : index
    %c0_94 = arith.constant 0 : index
    %204 = vector.load %arg11[%c1_92, %c0_93, %c0_94] : memref<2x1x32xf32, #tpu.memory_space<vmem>>, vector<1x1x32xf32>
    %205 = vector.shape_cast %204 : vector<1x1x32xf32> to vector<1x32xf32>
    %c1_95 = arith.constant 1 : index
    %c0_96 = arith.constant 0 : index
    %c0_97 = arith.constant 0 : index
    %206 = vector.load %arg12[%c1_95, %c0_96, %c0_97] : memref<2x1x32xf32, #tpu.memory_space<vmem>>, vector<1x1x32xf32>
    %207 = vector.shape_cast %206 : vector<1x1x32xf32> to vector<1x32xf32>
    %c1_98 = arith.constant 1 : index
    %c0_99 = arith.constant 0 : index
    %c0_100 = arith.constant 0 : index
    %208 = vector.load %arg13[%c1_98, %c0_99, %c0_100] : memref<2x1x32xf32, #tpu.memory_space<vmem>>, vector<1x1x32xf32>
    %209 = vector.shape_cast %208 : vector<1x1x32xf32> to vector<1x32xf32>
    %c1_101 = arith.constant 1 : index
    %c0_102 = arith.constant 0 : index
    %c0_103 = arith.constant 0 : index
    %210 = vector.load %arg14[%c1_101, %c0_102, %c0_103] : memref<2x32x128xbf16, #tpu.memory_space<vmem>>, vector<1x32x128xbf16>
    %211 = vector.shape_cast %210 : vector<1x32x128xbf16> to vector<32x128xbf16>
    %c1_104 = arith.constant 1 : index
    %c0_105 = arith.constant 0 : index
    %c0_106 = arith.constant 0 : index
    %212 = vector.load %arg15[%c1_104, %c0_105, %c0_106] : memref<2x1x128xf32, #tpu.memory_space<vmem>>, vector<1x1x128xf32>
    %213 = vector.shape_cast %212 : vector<1x1x128xf32> to vector<1x128xf32>
    %c1_107 = arith.constant 1 : index
    %c0_108 = arith.constant 0 : index
    %c0_109 = arith.constant 0 : index
    %214 = vector.load %arg16[%c1_107, %c0_108, %c0_109] : memref<2x128x32xbf16, #tpu.memory_space<vmem>>, vector<1x128x32xbf16>
    %215 = vector.shape_cast %214 : vector<1x128x32xbf16> to vector<128x32xbf16>
    %c1_110 = arith.constant 1 : index
    %c0_111 = arith.constant 0 : index
    %c0_112 = arith.constant 0 : index
    %216 = vector.load %arg17[%c1_110, %c0_111, %c0_112] : memref<2x1x32xf32, #tpu.memory_space<vmem>>, vector<1x1x32xf32>
    %217 = vector.shape_cast %216 : vector<1x1x32xf32> to vector<1x32xf32>
    %cst_113 = arith.constant dense<0.000000e+00> : vector<8xf32>
    %218 = vector.multi_reduction <add>, %193, %cst_113 [1] : vector<8x32xf32> to vector<8xf32>
    %219 = vector.shape_cast %218 : vector<8xf32> to vector<8x1xf32>
    %cst_114 = arith.constant 3.200000e+01 : f32
    %220 = vector.broadcast %cst_114 : f32 to vector<8x1xf32>
    %221 = arith.divf %219, %220 : vector<8x1xf32>
    %222 = vector.broadcast %221 : vector<8x1xf32> to vector<8x32xf32>
    %223 = arith.subf %193, %222 : vector<8x32xf32>
    %224 = arith.mulf %223, %223 : vector<8x32xf32>
    %cst_115 = arith.constant dense<0.000000e+00> : vector<8xf32>
    %225 = vector.multi_reduction <add>, %224, %cst_115 [1] : vector<8x32xf32> to vector<8xf32>
    %226 = vector.shape_cast %225 : vector<8xf32> to vector<8x1xf32>
    %cst_116 = arith.constant 3.200000e+01 : f32
    %227 = vector.broadcast %cst_116 : f32 to vector<8x1xf32>
    %228 = arith.divf %226, %227 : vector<8x1xf32>
    %229 = vector.broadcast %221 : vector<8x1xf32> to vector<8x32xf32>
    %230 = arith.subf %193, %229 : vector<8x32xf32>
    %cst_117 = arith.constant 9.99999974E-6 : f32
    %231 = vector.broadcast %cst_117 : f32 to vector<8x1xf32>
    %232 = arith.addf %228, %231 : vector<8x1xf32>
    %233 = math.rsqrt %232 : vector<8x1xf32>
    %234 = vector.broadcast %233 : vector<8x1xf32> to vector<8x32xf32>
    %235 = arith.mulf %230, %234 : vector<8x32xf32>
    %236 = vector.broadcast %203 : vector<1x32xf32> to vector<8x32xf32>
    %237 = arith.mulf %235, %236 : vector<8x32xf32>
    %238 = vector.broadcast %205 : vector<1x32xf32> to vector<8x32xf32>
    %239 = arith.addf %237, %238 : vector<8x32xf32>
    %240 = arith.truncf %239 : vector<8x32xf32> to vector<8x32xbf16>
    %cst_118 = arith.constant dense<0.000000e+00> : vector<8x96xf32>
    %241 = tpu.matmul %240, %195, %cst_118 {dimension_numbers = #tpu.dot_dimension_numbers<[1], [0], [0], [1], [0, 0, 1, 1], [], []>} : vector<8x32xbf16>, vector<32x96xbf16>, vector<8x96xf32> -> vector<8x96xf32>
    %242 = vector.broadcast %197 : vector<1x96xf32> to vector<8x96xf32>
    %243 = arith.addf %241, %242 : vector<8x96xf32>
    %244 = vector.extract_strided_slice %243 {offsets = [0, 0], sizes = [8, 8], strides = [1, 1]} : vector<8x96xf32> to vector<8x8xf32>
    %245 = arith.truncf %244 : vector<8x8xf32> to vector<8x8xbf16>
    %246 = vector.extract_strided_slice %243 {offsets = [0, 32], sizes = [8, 8], strides = [1, 1]} : vector<8x96xf32> to vector<8x8xf32>
    %247 = arith.truncf %246 : vector<8x8xf32> to vector<8x8xbf16>
    %248 = vector.extract_strided_slice %243 {offsets = [0, 64], sizes = [8, 8], strides = [1, 1]} : vector<8x96xf32> to vector<8x8xf32>
    %249 = arith.truncf %248 : vector<8x8xf32> to vector<8x8xbf16>
    %cst_119 = arith.constant dense<0.000000e+00> : vector<8x8xf32>
    %250 = tpu.matmul %245, %247, %cst_119 {dimension_numbers = #tpu.dot_dimension_numbers<[1], [1], [0], [0], [0, 0, 1, 0], [], []>} : vector<8x8xbf16>, vector<8x8xbf16>, vector<8x8xf32> -> vector<8x8xf32>
    %251 = arith.addf %250, %16 : vector<8x8xf32>
    %cst_120 = arith.constant dense<0xFF800000> : vector<8xf32>
    %252 = vector.multi_reduction <maximumf>, %251, %cst_120 [1] : vector<8x8xf32> to vector<8xf32>
    %253 = vector.shape_cast %252 : vector<8xf32> to vector<8x1xf32>
    %254 = vector.broadcast %253 : vector<8x1xf32> to vector<8x8xf32>
    %255 = arith.subf %251, %254 : vector<8x8xf32>
    %256 = math.exp %255 : vector<8x8xf32>
    %cst_121 = arith.constant dense<0.000000e+00> : vector<8xf32>
    %257 = vector.multi_reduction <add>, %256, %cst_121 [1] : vector<8x8xf32> to vector<8xf32>
    %258 = vector.shape_cast %257 : vector<8xf32> to vector<8x1xf32>
    %259 = vector.broadcast %258 : vector<8x1xf32> to vector<8x8xf32>
    %260 = arith.divf %256, %259 : vector<8x8xf32>
    %261 = arith.truncf %260 : vector<8x8xf32> to vector<8x8xbf16>
    %cst_122 = arith.constant dense<0.000000e+00> : vector<8x8xf32>
    %262 = tpu.matmul %261, %249, %cst_122 {dimension_numbers = #tpu.dot_dimension_numbers<[1], [0], [0], [1], [0, 0, 1, 1], [], []>} : vector<8x8xbf16>, vector<8x8xbf16>, vector<8x8xf32> -> vector<8x8xf32>
    %263 = arith.truncf %262 : vector<8x8xf32> to vector<8x8xbf16>
    %264 = vector.extract_strided_slice %199 {offsets = [0, 0], sizes = [8, 32], strides = [1, 1]} : vector<32x32xbf16> to vector<8x32xbf16>
    %cst_123 = arith.constant dense<0.000000e+00> : vector<8x32xf32>
    %265 = tpu.matmul %263, %264, %cst_123 {dimension_numbers = #tpu.dot_dimension_numbers<[1], [0], [0], [1], [0, 0, 1, 1], [], []>} : vector<8x8xbf16>, vector<8x32xbf16>, vector<8x32xf32> -> vector<8x32xf32>
    %266 = vector.extract_strided_slice %243 {offsets = [0, 8], sizes = [8, 8], strides = [1, 1]} : vector<8x96xf32> to vector<8x8xf32>
    %267 = arith.truncf %266 : vector<8x8xf32> to vector<8x8xbf16>
    %268 = vector.extract_strided_slice %243 {offsets = [0, 40], sizes = [8, 8], strides = [1, 1]} : vector<8x96xf32> to vector<8x8xf32>
    %269 = arith.truncf %268 : vector<8x8xf32> to vector<8x8xbf16>
    %270 = vector.extract_strided_slice %243 {offsets = [0, 72], sizes = [8, 8], strides = [1, 1]} : vector<8x96xf32> to vector<8x8xf32>
    %271 = arith.truncf %270 : vector<8x8xf32> to vector<8x8xbf16>
    %cst_124 = arith.constant dense<0.000000e+00> : vector<8x8xf32>
    %272 = tpu.matmul %267, %269, %cst_124 {dimension_numbers = #tpu.dot_dimension_numbers<[1], [1], [0], [0], [0, 0, 1, 0], [], []>} : vector<8x8xbf16>, vector<8x8xbf16>, vector<8x8xf32> -> vector<8x8xf32>
    %273 = arith.addf %272, %16 : vector<8x8xf32>
    %cst_125 = arith.constant dense<0xFF800000> : vector<8xf32>
    %274 = vector.multi_reduction <maximumf>, %273, %cst_125 [1] : vector<8x8xf32> to vector<8xf32>
    %275 = vector.shape_cast %274 : vector<8xf32> to vector<8x1xf32>
    %276 = vector.broadcast %275 : vector<8x1xf32> to vector<8x8xf32>
    %277 = arith.subf %273, %276 : vector<8x8xf32>
    %278 = math.exp %277 : vector<8x8xf32>
    %cst_126 = arith.constant dense<0.000000e+00> : vector<8xf32>
    %279 = vector.multi_reduction <add>, %278, %cst_126 [1] : vector<8x8xf32> to vector<8xf32>
    %280 = vector.shape_cast %279 : vector<8xf32> to vector<8x1xf32>
    %281 = vector.broadcast %280 : vector<8x1xf32> to vector<8x8xf32>
    %282 = arith.divf %278, %281 : vector<8x8xf32>
    %283 = arith.truncf %282 : vector<8x8xf32> to vector<8x8xbf16>
    %cst_127 = arith.constant dense<0.000000e+00> : vector<8x8xf32>
    %284 = tpu.matmul %283, %271, %cst_127 {dimension_numbers = #tpu.dot_dimension_numbers<[1], [0], [0], [1], [0, 0, 1, 1], [], []>} : vector<8x8xbf16>, vector<8x8xbf16>, vector<8x8xf32> -> vector<8x8xf32>
    %285 = arith.truncf %284 : vector<8x8xf32> to vector<8x8xbf16>
    %286 = vector.extract_strided_slice %199 {offsets = [8, 0], sizes = [8, 32], strides = [1, 1]} : vector<32x32xbf16> to vector<8x32xbf16>
    %cst_128 = arith.constant dense<0.000000e+00> : vector<8x32xf32>
    %287 = tpu.matmul %285, %286, %cst_128 {dimension_numbers = #tpu.dot_dimension_numbers<[1], [0], [0], [1], [0, 0, 1, 1], [], []>} : vector<8x8xbf16>, vector<8x32xbf16>, vector<8x32xf32> -> vector<8x32xf32>
    %288 = arith.addf %265, %287 : vector<8x32xf32>
    %289 = vector.extract_strided_slice %243 {offsets = [0, 16], sizes = [8, 8], strides = [1, 1]} : vector<8x96xf32> to vector<8x8xf32>
    %290 = arith.truncf %289 : vector<8x8xf32> to vector<8x8xbf16>
    %291 = vector.extract_strided_slice %243 {offsets = [0, 48], sizes = [8, 8], strides = [1, 1]} : vector<8x96xf32> to vector<8x8xf32>
    %292 = arith.truncf %291 : vector<8x8xf32> to vector<8x8xbf16>
    %293 = vector.extract_strided_slice %243 {offsets = [0, 80], sizes = [8, 8], strides = [1, 1]} : vector<8x96xf32> to vector<8x8xf32>
    %294 = arith.truncf %293 : vector<8x8xf32> to vector<8x8xbf16>
    %cst_129 = arith.constant dense<0.000000e+00> : vector<8x8xf32>
    %295 = tpu.matmul %290, %292, %cst_129 {dimension_numbers = #tpu.dot_dimension_numbers<[1], [1], [0], [0], [0, 0, 1, 0], [], []>} : vector<8x8xbf16>, vector<8x8xbf16>, vector<8x8xf32> -> vector<8x8xf32>
    %296 = arith.addf %295, %16 : vector<8x8xf32>
    %cst_130 = arith.constant dense<0xFF800000> : vector<8xf32>
    %297 = vector.multi_reduction <maximumf>, %296, %cst_130 [1] : vector<8x8xf32> to vector<8xf32>
    %298 = vector.shape_cast %297 : vector<8xf32> to vector<8x1xf32>
    %299 = vector.broadcast %298 : vector<8x1xf32> to vector<8x8xf32>
    %300 = arith.subf %296, %299 : vector<8x8xf32>
    %301 = math.exp %300 : vector<8x8xf32>
    %cst_131 = arith.constant dense<0.000000e+00> : vector<8xf32>
    %302 = vector.multi_reduction <add>, %301, %cst_131 [1] : vector<8x8xf32> to vector<8xf32>
    %303 = vector.shape_cast %302 : vector<8xf32> to vector<8x1xf32>
    %304 = vector.broadcast %303 : vector<8x1xf32> to vector<8x8xf32>
    %305 = arith.divf %301, %304 : vector<8x8xf32>
    %306 = arith.truncf %305 : vector<8x8xf32> to vector<8x8xbf16>
    %cst_132 = arith.constant dense<0.000000e+00> : vector<8x8xf32>
    %307 = tpu.matmul %306, %294, %cst_132 {dimension_numbers = #tpu.dot_dimension_numbers<[1], [0], [0], [1], [0, 0, 1, 1], [], []>} : vector<8x8xbf16>, vector<8x8xbf16>, vector<8x8xf32> -> vector<8x8xf32>
    %308 = arith.truncf %307 : vector<8x8xf32> to vector<8x8xbf16>
    %309 = vector.extract_strided_slice %199 {offsets = [16, 0], sizes = [8, 32], strides = [1, 1]} : vector<32x32xbf16> to vector<8x32xbf16>
    %cst_133 = arith.constant dense<0.000000e+00> : vector<8x32xf32>
    %310 = tpu.matmul %308, %309, %cst_133 {dimension_numbers = #tpu.dot_dimension_numbers<[1], [0], [0], [1], [0, 0, 1, 1], [], []>} : vector<8x8xbf16>, vector<8x32xbf16>, vector<8x32xf32> -> vector<8x32xf32>
    %311 = arith.addf %288, %310 : vector<8x32xf32>
    %312 = vector.extract_strided_slice %243 {offsets = [0, 24], sizes = [8, 8], strides = [1, 1]} : vector<8x96xf32> to vector<8x8xf32>
    %313 = arith.truncf %312 : vector<8x8xf32> to vector<8x8xbf16>
    %314 = vector.extract_strided_slice %243 {offsets = [0, 56], sizes = [8, 8], strides = [1, 1]} : vector<8x96xf32> to vector<8x8xf32>
    %315 = arith.truncf %314 : vector<8x8xf32> to vector<8x8xbf16>
    %316 = vector.extract_strided_slice %243 {offsets = [0, 88], sizes = [8, 8], strides = [1, 1]} : vector<8x96xf32> to vector<8x8xf32>
    %317 = arith.truncf %316 : vector<8x8xf32> to vector<8x8xbf16>
    %cst_134 = arith.constant dense<0.000000e+00> : vector<8x8xf32>
    %318 = tpu.matmul %313, %315, %cst_134 {dimension_numbers = #tpu.dot_dimension_numbers<[1], [1], [0], [0], [0, 0, 1, 0], [], []>} : vector<8x8xbf16>, vector<8x8xbf16>, vector<8x8xf32> -> vector<8x8xf32>
    %319 = arith.addf %318, %16 : vector<8x8xf32>
    %cst_135 = arith.constant dense<0xFF800000> : vector<8xf32>
    %320 = vector.multi_reduction <maximumf>, %319, %cst_135 [1] : vector<8x8xf32> to vector<8xf32>
    %321 = vector.shape_cast %320 : vector<8xf32> to vector<8x1xf32>
    %322 = vector.broadcast %321 : vector<8x1xf32> to vector<8x8xf32>
    %323 = arith.subf %319, %322 : vector<8x8xf32>
    %324 = math.exp %323 : vector<8x8xf32>
    %cst_136 = arith.constant dense<0.000000e+00> : vector<8xf32>
    %325 = vector.multi_reduction <add>, %324, %cst_136 [1] : vector<8x8xf32> to vector<8xf32>
    %326 = vector.shape_cast %325 : vector<8xf32> to vector<8x1xf32>
    %327 = vector.broadcast %326 : vector<8x1xf32> to vector<8x8xf32>
    %328 = arith.divf %324, %327 : vector<8x8xf32>
    %329 = arith.truncf %328 : vector<8x8xf32> to vector<8x8xbf16>
    %cst_137 = arith.constant dense<0.000000e+00> : vector<8x8xf32>
    %330 = tpu.matmul %329, %317, %cst_137 {dimension_numbers = #tpu.dot_dimension_numbers<[1], [0], [0], [1], [0, 0, 1, 1], [], []>} : vector<8x8xbf16>, vector<8x8xbf16>, vector<8x8xf32> -> vector<8x8xf32>
    %331 = arith.truncf %330 : vector<8x8xf32> to vector<8x8xbf16>
    %332 = vector.extract_strided_slice %199 {offsets = [24, 0], sizes = [8, 32], strides = [1, 1]} : vector<32x32xbf16> to vector<8x32xbf16>
    %cst_138 = arith.constant dense<0.000000e+00> : vector<8x32xf32>
    %333 = tpu.matmul %331, %332, %cst_138 {dimension_numbers = #tpu.dot_dimension_numbers<[1], [0], [0], [1], [0, 0, 1, 1], [], []>} : vector<8x8xbf16>, vector<8x32xbf16>, vector<8x32xf32> -> vector<8x32xf32>
    %334 = arith.addf %311, %333 : vector<8x32xf32>
    %335 = arith.addf %193, %334 : vector<8x32xf32>
    %336 = vector.broadcast %201 : vector<1x32xf32> to vector<8x32xf32>
    %337 = arith.addf %335, %336 : vector<8x32xf32>
    %cst_139 = arith.constant dense<0.000000e+00> : vector<8xf32>
    %338 = vector.multi_reduction <add>, %337, %cst_139 [1] : vector<8x32xf32> to vector<8xf32>
    %339 = vector.shape_cast %338 : vector<8xf32> to vector<8x1xf32>
    %cst_140 = arith.constant 3.200000e+01 : f32
    %340 = vector.broadcast %cst_140 : f32 to vector<8x1xf32>
    %341 = arith.divf %339, %340 : vector<8x1xf32>
    %342 = vector.broadcast %341 : vector<8x1xf32> to vector<8x32xf32>
    %343 = arith.subf %337, %342 : vector<8x32xf32>
    %344 = arith.mulf %343, %343 : vector<8x32xf32>
    %cst_141 = arith.constant dense<0.000000e+00> : vector<8xf32>
    %345 = vector.multi_reduction <add>, %344, %cst_141 [1] : vector<8x32xf32> to vector<8xf32>
    %346 = vector.shape_cast %345 : vector<8xf32> to vector<8x1xf32>
    %cst_142 = arith.constant 3.200000e+01 : f32
    %347 = vector.broadcast %cst_142 : f32 to vector<8x1xf32>
    %348 = arith.divf %346, %347 : vector<8x1xf32>
    %349 = vector.broadcast %341 : vector<8x1xf32> to vector<8x32xf32>
    %350 = arith.subf %337, %349 : vector<8x32xf32>
    %cst_143 = arith.constant 9.99999974E-6 : f32
    %351 = vector.broadcast %cst_143 : f32 to vector<8x1xf32>
    %352 = arith.addf %348, %351 : vector<8x1xf32>
    %353 = math.rsqrt %352 : vector<8x1xf32>
    %354 = vector.broadcast %353 : vector<8x1xf32> to vector<8x32xf32>
    %355 = arith.mulf %350, %354 : vector<8x32xf32>
    %356 = vector.broadcast %207 : vector<1x32xf32> to vector<8x32xf32>
    %357 = arith.mulf %355, %356 : vector<8x32xf32>
    %358 = vector.broadcast %209 : vector<1x32xf32> to vector<8x32xf32>
    %359 = arith.addf %357, %358 : vector<8x32xf32>
    %360 = arith.truncf %359 : vector<8x32xf32> to vector<8x32xbf16>
    %cst_144 = arith.constant dense<0.000000e+00> : vector<8x128xf32>
    %361 = tpu.matmul %360, %211, %cst_144 {dimension_numbers = #tpu.dot_dimension_numbers<[1], [0], [0], [1], [0, 0, 1, 1], [], []>} : vector<8x32xbf16>, vector<32x128xbf16>, vector<8x128xf32> -> vector<8x128xf32>
    %362 = vector.broadcast %213 : vector<1x128xf32> to vector<8x128xf32>
    %363 = arith.addf %361, %362 : vector<8x128xf32>
    %cst_145 = arith.constant 0.000000e+00 : f32
    %364 = vector.broadcast %cst_145 : f32 to vector<8x128xf32>
    %365 = arith.maximumf %363, %364 : vector<8x128xf32>
    %366 = arith.truncf %365 : vector<8x128xf32> to vector<8x128xbf16>
    %cst_146 = arith.constant dense<0.000000e+00> : vector<8x32xf32>
    %367 = tpu.matmul %366, %215, %cst_146 {dimension_numbers = #tpu.dot_dimension_numbers<[1], [0], [0], [1], [0, 0, 1, 1], [], []>} : vector<8x128xbf16>, vector<128x32xbf16>, vector<8x32xf32> -> vector<8x32xf32>
    %368 = arith.addf %337, %367 : vector<8x32xf32>
    %369 = vector.broadcast %217 : vector<1x32xf32> to vector<8x32xf32>
    %370 = arith.addf %368, %369 : vector<8x32xf32>
    %371 = arith.truncf %370 : vector<8x32xf32> to vector<8x32xbf16>
    %c0_147 = arith.constant 0 : index
    %c0_148 = arith.constant 0 : index
    %372 = vector.load %arg4[%c0_147, %c0_148] : memref<32x128xbf16, #tpu.memory_space<vmem>>, vector<32x128xbf16>
    %cst_149 = arith.constant dense<0.000000e+00> : vector<8x128xf32>
    %373 = tpu.matmul %371, %372, %cst_149 {dimension_numbers = #tpu.dot_dimension_numbers<[1], [0], [0], [1], [0, 0, 1, 1], [], []>} : vector<8x32xbf16>, vector<32x128xbf16>, vector<8x128xf32> -> vector<8x128xf32>
    %c0_150 = arith.constant 0 : index
    %c0_151 = arith.constant 0 : index
    %374 = vector.load %arg5[%c0_150, %c0_151] : memref<1x128xf32, #tpu.memory_space<vmem>>, vector<1x128xf32>
    %375 = vector.broadcast %374 : vector<1x128xf32> to vector<8x128xf32>
    %376 = arith.addf %373, %375 : vector<8x128xf32>
    %c0_152 = arith.constant 0 : index
    %c0_153 = arith.constant 0 : index
    %c0_154 = arith.constant 0 : index
    %377 = vector.load %arg18[%c0_152, %c0_153, %c0_154] : memref<1x8x128xf32, #tpu.memory_space<vmem>>, vector<1x8x128xf32>
    %378 = vector.shape_cast %377 : vector<1x8x128xf32> to vector<8x128xf32>
    %379 = vector.shape_cast %376 : vector<8x128xf32> to vector<1x8x128xf32>
    tpu.vector_store %arg18[%c0_152, %c0_153, %c0_154], %379 {strides = array<i32>} : memref<1x8x128xf32, #tpu.memory_space<vmem>>, vector<1x8x128xf32>,
    return
  }
  func.func @transform_0(%arg0: i32) -> (i32, i32, i32) {
    %c0_i32 = arith.constant 0 : i32
    %c0_i32_0 = arith.constant 0 : i32
    %c0_i32_1 = arith.constant 0 : i32
    return %arg0, %c0_i32, %c0_i32_0 : i32, i32, i32
  }
  func.func @transform_1(%arg0: i32) -> (i32, i32) {
    %c0_i32 = arith.constant 0 : i32
    %c0_i32_0 = arith.constant 0 : i32
    %c0_i32_1 = arith.constant 0 : i32
    return %c0_i32, %c0_i32_0 : i32, i32
  }
  func.func @transform_2(%arg0: i32) -> (i32, i32) {
    %c0_i32 = arith.constant 0 : i32
    %c0_i32_0 = arith.constant 0 : i32
    %c0_i32_1 = arith.constant 0 : i32
    return %c0_i32, %c0_i32_0 : i32, i32
  }
  func.func @transform_3(%arg0: i32) -> (i32, i32) {
    %c0_i32 = arith.constant 0 : i32
    %c0_i32_0 = arith.constant 0 : i32
    %c0_i32_1 = arith.constant 0 : i32
    return %c0_i32, %c0_i32_0 : i32, i32
  }
  func.func @transform_4(%arg0: i32) -> (i32, i32) {
    %c0_i32 = arith.constant 0 : i32
    %c0_i32_0 = arith.constant 0 : i32
    %c0_i32_1 = arith.constant 0 : i32
    return %c0_i32, %c0_i32_0 : i32, i32
  }
  func.func @transform_5(%arg0: i32) -> (i32, i32, i32) {
    %c0_i32 = arith.constant 0 : i32
    %c0_i32_0 = arith.constant 0 : i32
    %c0_i32_1 = arith.constant 0 : i32
    %c0_i32_2 = arith.constant 0 : i32
    return %c0_i32, %c0_i32_0, %c0_i32_1 : i32, i32, i32
  }
  func.func @transform_6(%arg0: i32) -> (i32, i32, i32) {
    %c0_i32 = arith.constant 0 : i32
    %c0_i32_0 = arith.constant 0 : i32
    %c0_i32_1 = arith.constant 0 : i32
    %c0_i32_2 = arith.constant 0 : i32
    return %c0_i32, %c0_i32_0, %c0_i32_1 : i32, i32, i32
  }
  func.func @transform_7(%arg0: i32) -> (i32, i32, i32) {
    %c0_i32 = arith.constant 0 : i32
    %c0_i32_0 = arith.constant 0 : i32
    %c0_i32_1 = arith.constant 0 : i32
    %c0_i32_2 = arith.constant 0 : i32
    return %c0_i32, %c0_i32_0, %c0_i32_1 : i32, i32, i32
  }
  func.func @transform_8(%arg0: i32) -> (i32, i32, i32) {
    %c0_i32 = arith.constant 0 : i32
    %c0_i32_0 = arith.constant 0 : i32
    %c0_i32_1 = arith.constant 0 : i32
    %c0_i32_2 = arith.constant 0 : i32
    return %c0_i32, %c0_i32_0, %c0_i32_1 : i32, i32, i32
  }
  func.func @transform_9(%arg0: i32) -> (i32, i32, i32) {
    %c0_i32 = arith.constant 0 : i32
    %c0_i32_0 = arith.constant 0 : i32
    %c0_i32_1 = arith.constant 0 : i32
    %c0_i32_2 = arith.constant 0 : i32
    return %c0_i32, %c0_i32_0, %c0_i32_1 : i32, i32, i32
  }
  func.func @transform_10(%arg0: i32) -> (i32, i32, i32) {
    %c0_i32 = arith.constant 0 : i32
    %c0_i32_0 = arith.constant 0 : i32
    %c0_i32_1 = arith.constant 0 : i32
    %c0_i32_2 = arith.constant 0 : i32
    return %c0_i32, %c0_i32_0, %c0_i32_1 : i32, i32, i32
  }
  func.func @transform_11(%arg0: i32) -> (i32, i32, i32) {
    %c0_i32 = arith.constant 0 : i32
    %c0_i32_0 = arith.constant 0 : i32
    %c0_i32_1 = arith.constant 0 : i32
    %c0_i32_2 = arith.constant 0 : i32
    return %c0_i32, %c0_i32_0, %c0_i32_1 : i32, i32, i32
  }
  func.func @transform_12(%arg0: i32) -> (i32, i32, i32) {
    %c0_i32 = arith.constant 0 : i32
    %c0_i32_0 = arith.constant 0 : i32
    %c0_i32_1 = arith.constant 0 : i32
    %c0_i32_2 = arith.constant 0 : i32
    return %c0_i32, %c0_i32_0, %c0_i32_1 : i32, i32, i32
  }
  func.func @transform_13(%arg0: i32) -> (i32, i32, i32) {
    %c0_i32 = arith.constant 0 : i32
    %c0_i32_0 = arith.constant 0 : i32
    %c0_i32_1 = arith.constant 0 : i32
    %c0_i32_2 = arith.constant 0 : i32
    return %c0_i32, %c0_i32_0, %c0_i32_1 : i32, i32, i32
  }
  func.func @transform_14(%arg0: i32) -> (i32, i32, i32) {
    %c0_i32 = arith.constant 0 : i32
    %c0_i32_0 = arith.constant 0 : i32
    %c0_i32_1 = arith.constant 0 : i32
    %c0_i32_2 = arith.constant 0 : i32
    return %c0_i32, %c0_i32_0, %c0_i32_1 : i32, i32, i32
  }
  func.func @transform_15(%arg0: i32) -> (i32, i32, i32) {
    %c0_i32 = arith.constant 0 : i32
    %c0_i32_0 = arith.constant 0 : i32
    %c0_i32_1 = arith.constant 0 : i32
    %c0_i32_2 = arith.constant 0 : i32
    return %c0_i32, %c0_i32_0, %c0_i32_1 : i32, i32, i32
  }
  func.func @transform_16(%arg0: i32) -> (i32, i32, i32) {
    %c0_i32 = arith.constant 0 : i32
    %c0_i32_0 = arith.constant 0 : i32
    %c0_i32_1 = arith.constant 0 : i32
    %c0_i32_2 = arith.constant 0 : i32
    return %c0_i32, %c0_i32_0, %c0_i32_1 : i32, i32, i32
  }
  func.func @transform_17(%arg0: i32) -> (i32, i32, i32) {
    %c0_i32 = arith.constant 0 : i32
    %c0_i32_0 = arith.constant 0 : i32
    %c0_i32_1 = arith.constant 0 : i32
    return %arg0, %c0_i32, %c0_i32_0 : i32, i32, i32
  }
}

</mosaic_0001>

<bundles_post_ra>
// kernel: slm_forward.1
= control target key start
LH: loop header
LB: loop body
LE: loop exit
PB: predicated region body
PF: predicated region fallthrough
CT: control target
= control target key end

     0   :  { %s4079_s0 = inlined_call_operand.vmem [shape: s32[2,8,1], index: 0, kind: input, shape index: {}]   ;;  %s4080_s1 = inlined_call_operand.vmem [shape: f32[8,32], index: 1, kind: input, shape index: {}]   ;;  %s4081_s2 = inlined_call_operand.vmem [shape: f32[128,32], index: 2, kind: input, shape index: {}]   ;;  %s4082_s3 = inlined_call_operand.vmem [shape: bf16[32,128], index: 3, kind: input, shape index: {}]   ;;  %s4083_s4 = inlined_call_operand.vmem [shape: f32[1,128], index: 4, kind: input, shape index: {}]   ;;  %s4084_s5 = inlined_call_operand.vmem [shape: bf16[2,32,96], index: 5, kind: input, shape index: {}]   ;;  %s4085_s6 = inlined_call_operand.vmem [shape: f32[2,1,96], index: 6, kind: input, shape index: {}]   ;;  %s4086_s7 = inlined_call_operand.vmem [shape: bf16[2,32,32], index: 7, kind: input, shape index: {}]   ;;  %s4087_s8 = inlined_call_operand.vmem [shape: f32[2,1,32], index: 8, kind: input, shape index: {}]   ;;  %s4088_s9 = inlined_call_operand.vmem [shape: f32[2,1,32], index: 9, kind: input, shape index: {}]   ;;  %s4089_s10 = inlined_call_operand.vmem [shape: f32[2,1,32], index: 10, kind: input, shape index: {}]   ;;  %s4090_s11 = inlined_call_operand.vmem [shape: f32[2,1,32], index: 11, kind: input, shape index: {}]   ;;  %s4091_s12 = inlined_call_operand.vmem [shape: f32[2,1,32], index: 12, kind: input, shape index: {}]   ;;  %s4092_s13 = inlined_call_operand.vmem [shape: bf16[2,32,128], index: 13, kind: input, shape index: {}]   ;;  %s4093_s14 = inlined_call_operand.vmem [shape: f32[2,1,128], index: 14, kind: input, shape index: {}]   ;;  %s4094_s15 = inlined_call_operand.vmem [shape: bf16[2,128,32], index: 15, kind: input, shape index: {}]   ;;  %s4095_s16 = inlined_call_operand.vmem [shape: f32[2,1,32], index: 16, kind: input, shape index: {}]   ;;  %s4096_s17 = inlined_call_operand.hbm [shape: f32[2,8,128], index: 17, kind: output, shape index: {}]  }
   0x1   :  { %4110 = sst [smem:[#allocation11_spill]] %s4079_s0 }
   0x2   :  { %4111 = sst [smem:[#allocation12_spill]] %s4080_s1 }
   0x3   :  { %22 = vsyncpa [#allocation3], 0 }
   0x4   :  { %24 = vsyncpa [#allocation3 + $0x1], 0  ;;  %s3498_s24 = smov 0   ;;  %s3500_s25 = smov 0  }
   0x5   :  { %s3502_s26 = smov 0   ;;  %s3504_s27 = smov 0  }
   0x6 LB: > { %4112 = sst [smem:[#allocation5_spill]] %s3376_s24  ;;  %s3519_s28 = sadd.s32 4294967295, %s3388_s27   ;;  %s3388_s27 = sphi %s3504_s27, %s4132_s27   ;;  %s3384_s26 = sphi %s3502_s26, %s4134_s26   ;;  %s3380_s25 = sphi %s3500_s25, %s4136_s25   ;;  %s3376_s24 = sphi %s3498_s24, %s4135_s24  }
   0x7   : > { %4113 = sst [smem:[#allocation6_spill]] %s3384_s26  ;;  %s2702_s29 = sadd.s32 4294967294, %s3388_s27  }
   0x8   : > { %4114 = sst [smem:[#allocation7_spill]] %s3388_s27  ;;  %s3523_s0 = sadd.s32 1, %s3388_s27  }
   0x9   : > { %4115 = sst [smem:[#allocation8_spill]] %s3523_s0  ;;  %s399_s30 = sadd.s32 1, %s3384_s26 }
   0xa   : > { %s396_s18 = ssub.s32 %s3388_s27, %s3523_s0  ;;  %p409_p0 = scmp.ne.s32.totalorder %s3384_s26, %s3380_s25 }
   0xb   : > { %p397_p1 = scmp.eq.s32.totalorder %s396_s18, 0  ;;  %p410_p2 = scmp.eq.s32.totalorder %s3519_s28, 1 }
   0xc   : > { %p415_p3 = scmp.ne.s32.totalorder %s3380_s25, %s3376_s24  ;;  %p416_p4 = scmp.eq.s32.totalorder %s2702_s29, 1 }
   0xd   : > { %s3534_s19 = scalar_select %p397_p1, %s3384_s26, %s399_s30  }
   0xe   : > { %p3536_p5 = por %p410_p2, %p409_p0  ;;  %p3540_p6 = por %p416_p4, %p415_p3 }
   0xf   : > { %4116 = sst [smem:[#allocation9_spill]] %s3534_s19  ;;  %p2705_p7 = scmp.ge.s32.totalorder %s3388_s27, 1 }
  0x10   : > { %s4118_s20 = scalar_select %p3540_p6, 1, 0 }
  0x11   : > { %p489_p8 = scmp.lt.s32.totalorder %s3388_s27, 3 }
  0x12   : > { %4119 = sst [smem:[#allocation10_spill]] %s4118_s20 }
  0x13   : > { %p490_p9 = pnand %p2705_p7, %p489_p8 }
  0x14   : > { %p540_p10 = scmp.lt.s32.totalorder (!%p490_p9), %s3519_s28, 1  ;;  %v546_v0 = vld [vmem:[%s4081_s2] sm:$0xff] (!%p490_p9)  ;;  %v547_v1 = vld [vmem:[%s4081_s2 + $0x8] sm:$0xff] (!%p490_p9)  ;;  %v548_v2 = vld [vmem:[%s4081_s2 + $0x10] sm:$0xff] (!%p490_p9)  ;;  %v3390_v3 = vmov (!%p490_p9), 0   ;;  %v3391_v4 = vmov (!%p490_p9), 0.0|0.0   ;;  %v562_v28 = vlaneseq (!%p490_p9) }
  0x15   : > { %493 = sbr.rel (%p490_p9) target bundleno = 8992 (0x2320), region = 88  ;;  %3259 = vset.pattern.permute.xlu0 (!%p490_p9), %v3390_v3  ;;  %3179 = vmatprep.subr.bf16.mxu0 (!%p490_p9), %v3391_v4  ;;  %v3180_v5 = vpack.c.bf16 (!%p490_p9), %v547_v1, %v546_v0  ;;  %v549_v6 = vld [vmem:[%s4081_s2 + $0x18] sm:$0xff] (!%p490_p9)  ;;  %v550_v8 = vld [vmem:[%s4081_s2 + $0x20] sm:$0xff] (!%p490_p9)  ;;  %v551_v9 = vld [vmem:[%s4081_s2 + $0x28] sm:$0xff] (!%p490_p9)  ;;  %s4120_s24 = sld [smem:[#allocation11_spill]] (!%p490_p9)  ;;  %vm3392_vm0 = vmmov (!%p490_p9), 0  }
  0x16   : > { %v3183_v7 = vpack.c.bf16 (!%p490_p9), %v549_v6, %v548_v2  ;;  %v3186_v11 = vpack.c.bf16 (!%p490_p9), %v551_v9, %v550_v8  ;;  %v552_v12 = vld [vmem:[%s4081_s2 + $0x30] sm:$0xff] (!%p490_p9)  ;;  %v553_v13 = vld [vmem:[%s4081_s2 + $0x38] sm:$0xff] (!%p490_p9)  ;;  %v3393_v14 = vmov (!%p490_p9), 0.0   ;;  %v554_v15 = vld [vmem:[%s4081_s2 + $0x40] sm:$0xff] (!%p490_p9)  ;;  %v563_v29 = vand.u32 (!%p490_p9), 127, %v562_v28  ;;  %s4121_s30 = sld [smem:[#allocation12_spill]] (!%p490_p9) }
  0x17   : > { %3181 = vmatpush3.bf16.msra.mxu0 (!%p490_p9), %v3180_v5  ;;  %2952 = vmatprep.mubr.msk.f32.mxu0 (!%p490_p9), %vm3392_vm0, %v3393_v14  ;;  %v555_v16 = vld [vmem:[%s4081_s2 + $0x48] sm:$0xff] (!%p490_p9)  ;;  %v3189_v17 = vpack.c.bf16 (!%p490_p9), %v553_v13, %v552_v12  ;;  %v556_v18 = vld [vmem:[%s4081_s2 + $0x50] sm:$0xff] (!%p490_p9)  ;;  %v557_v19 = vld [vmem:[%s4081_s2 + $0x58] sm:$0xff] (!%p490_p9)  ;;  %v3394_v31 = vmov (!%p490_p9), 1.0   ;;  %vm681_vm2 = vcmask (!%p490_p9), 261120   ;;  %s3395_s29 = smov (!%p490_p9), 96  }
  0x18   : > { %3182 = vmatprep.subr.bf16.mxu0 (!%p490_p9), %v3391_v4  ;;  %2955 = vmatprep.subr.bf16.mxu1 (!%p490_p9), %v3393_v14  ;;  %v3192_v20 = vpack.c.bf16 (!%p490_p9), %v555_v16, %v554_v15  ;;  %v558_v21 = vld [vmem:[%s4081_s2 + $0x60] sm:$0xff] (!%p490_p9)  ;;  %v559_v22 = vld [vmem:[%s4081_s2 + $0x68] sm:$0xff] (!%p490_p9)  ;;  %v3195_v23 = vpack.c.bf16 (!%p490_p9), %v557_v19, %v556_v18  ;;  %v560_v25 = vld [vmem:[%s4081_s2 + $0x70] sm:$0xff] (!%p490_p9)  ;;  %vm776_vm3 = vcmask (!%p490_p9), 64512   ;;  %v642_v63 = vshrl.u32 (!%p490_p9), %v562_v28, 7  ;;  %s3398_s18 = smov (!%p490_p9), 64  }
  0x19   : > { %2959 = vmatprep.mubr.msk.bf16.mxu1 (!%p490_p9), %vm3392_vm0, %v3393_v14  ;;  %v3198_v24 = vpack.c.bf16 (!%p490_p9), %v559_v22, %v558_v21  ;;  %v561_v26 = vld [vmem:[%s4081_s2 + $0x78] sm:$0xff] (!%p490_p9)  ;;  %v3260_v42 = vld [vmem:[%s4084_s5] sm:$0xff] (!%p490_p9)   ;;  %v3261_v43 = vld [vmem:[%s4084_s5 + $0x8] sm:$0xff] (!%p490_p9)   ;;  %v3396_v0 = vmov (!%p490_p9), -1e+30   ;;  %s3399_s26 = smov (!%p490_p9), 120  }
  0x1a   : > { %v3201_v27 = vpack.c.bf16 (!%p490_p9), %v561_v26, %v560_v25  ;;  %2956 = vmatpush3.bf16.msra.mxu1 (!%p490_p9), %v3260_v42  ;;  %v2710_v48 = vld [vmem:[%s4088_s9] ss:$0 sm:$0xff] (!%p490_p9)  ;;  %vm643_vm4 = vcmp.ge.s32.totalorder (!%p490_p9), %v642_v63, %v563_v29  ;;  %vm840_vm5 = vcmask (!%p490_p9), 1043456   ;;  %s4109_s22 = smov (!%p490_p9), 56   ;;  %s4106_s23 = smov (!%p490_p9), 48  }
  0x1b   : > { %3184 = vmatpush3.bf16.msra.mxu0 (!%p490_p9), %v3183_v7  ;;  %2957 = vmatprep.subr.bf16.mxu1 (!%p490_p9), %v3393_v14  ;;  %v2711_v50 = vld [vmem:[%s4089_s10] ss:$0 sm:$0xff] (!%p490_p9)  ;;  %v3646_v1 = vsel (!%p490_p9), %vm643_vm4, 0.0, %v3396_v0  ;;  %s4103_s19 = smov (!%p490_p9), 104   ;;  %s4104_s20 = smov (!%p490_p9), 40  }
  0x1c   : > { %s541_s0 = scalar_select %p540_p10, %s3519_s28, 1  ;;  %3185 = vmatprep.subr.bf16.mxu0 %v3391_v4  ;;  %v570_v32 = vld [vmem:[%s4121_s30] sm:$0xff] }
  0x1d   : > { %v2712_v54 = vld [vmem:[%s4085_s6] ss:$0 sm:$0xff]  ;;  %s3397_s30 = smov 88  }
  0x1e   : > { %s2707_s21 = sshll.u32 %s541_s0, 3  ;;  %2958 = vmatpush3.bf16.msra.mxu1 %v3261_v43  ;;  %s4105_s0 = smov 72  }
  0x1f   : > { %s543_s27 = scalar_lea.vmem %s4120_s24, %s2707_s21  ;;  %3187 = vmatpush3.bf16.msra.mxu0 %v3186_v11  ;;  %2963 = vmatprep.subr.bf16.mxu1 %v3393_v14  ;;  %s4107_s24 = smov 112  }
  0x20   : > { %v545_v10 = vld [vmem:[%s543_s27] sm:$0xff]  ;;  %3188 = vmatprep.subr.bf16.mxu0 %v3391_v4  ;;  %s4108_s27 = smov 80   ;;  %s4127_s21 = smov 104  }
  0x21   : > { %565 = vperm.xlu0 %3259, %v545_v10  }
  0x23   : > { %3190 = vmatpush3.bf16.msra.mxu0 %v3189_v17 }
  0x24   : > { %3191 = vmatprep.subr.bf16.mxu0 %v3391_v4 }
  0x27   : > { %3193 = vmatpush3.bf16.msra.mxu0 %v3192_v20 }
  0x28   : > { %3194 = vmatprep.subr.bf16.mxu0 %v3391_v4 }
  0x2b   : > { %3196 = vmatpush3.bf16.msra.mxu0 %v3195_v23  ;;  %v650_v23 = vld [vmem:[%s4086_s7] sm:$0xf] }
  0x2c   : > { %3197 = vmatprep.subr.bf16.mxu0 %v3391_v4 }
  0x2f   : > { %3199 = vmatpush3.bf16.msra.mxu0 %v3198_v24  ;;  %v1046_v24 = vsel %vm840_vm5, %v650_v23, 0 }
  0x30   : > { %3200 = vmatprep.subr.bf16.mxu0 %v3391_v4 }
  0x33   : > { %3202 = vmatpush3.bf16.msra.mxu0 %v3201_v27 }
  0x34   : > { %2993 = vmatprep.subr.bf16.mxu0 %v3393_v14 }
  0xa0   : > { %v566_v30 = vpop.permute.xlu0 %565 }
  0xa1   : > { %vm567_vm1 = vcmp.eq.s32.totalorder %v563_v29, %v566_v30 }
  0xa2   : > { %2953 = vmatmul.mubr.msk.f32.vlgmr.msra.gmra.mrb[0].mxu0 %vm567_vm1, %v3394_v31 }
  0xa3   : > { %2995 = vmatprep.mubr.msk.bf16.mxu0 %vm3392_vm0, %v3393_v14  ;;  %2994 = vmatpush3.bf16.msra.mxu0 %v1046_v24 }
  0xa4   : > { %3005 = vmatprep.subr.bf16.mxu0 %v3393_v14 }
 0x175   : > { %v637_v33 = vpop.f32.mrb[0].mxu0 }
 0x176   : > { %v3610_v34 = vadd.f32 %v637_v33, %v570_v32  ;;  %v2954_v35 = vpop.f32.mrb[1].mxu0 }
 0x178   : > { %v682_v36 = vsel %vm681_vm2, %v3610_v34, 0.0 }
 0x179   : > { %683 = vadd.xlane.f32.xlu0 %v682_v36 }
 0x206   : > { %v684_v37 = vpop.xlane.xlu0 %683 }
 0x207   : > { %v686_v38 = vmul.f32 0.03125, %v684_v37 }
 0x209   : > { %v687_v39 = vsub.f32 %v3610_v34, %v686_v38 }
 0x20b   : > { %v688_v40 = vmul.f32 %v687_v39, %v687_v39 }
 0x20d   : > { %v689_v41 = vsel %vm681_vm2, %v688_v40, 0.0 }
 0x20e   : > { %690 = vadd.xlane.f32.xlu1 %v689_v41 }
 0x29b   : > { %v691_v44 = vpop.xlane.xlu1 %690 }
 0x29c   : > { %v692_v45 = vmul.f32 0.03125, %v691_v44 }
 0x29e   : > { %v693_v46 = vadd.f32 1e-05, %v692_v45 }
 0x2a0   : > { %3286 = vrsqrt.f32 %v693_v46 }
 0x2aa   : > { %v3287_v47 = vpop.eup %3286 }
 0x2ab   : > { %v695_v49 = vmul.f32 %v3287_v47, %v687_v39 }
 0x2ad   : > { %v702_v51 = vmul.f32 %v2710_v48, %v695_v49 }
 0x2af   : > { %v709_v52 = vadd.f32 %v2711_v50, %v702_v51  ;;  %v651_v50 = vld [vmem:[%s4086_s7 + $0x4] sm:$0xf] }
 0x2b1   : > { %v710_v53 = vpack.c.bf16 %v709_v52, %v709_v52 }
 0x2b3   : > { %2960 = vmatmul.mubr.msk.bf16.vlgmr.msra.gmra.mrb[0].mxu1 %vm681_vm2, %v710_v53  ;;  %v1000_v53 = vsel %vm840_vm5, %v651_v50, 0 }
 0x2b4   : > { %2965 = vmatprep.mubr.msk.bf16.mxu1 %vm3392_vm0, %v3393_v14 }
 0x386   : > { %v766_v55 = vpop.f32.mrb[0].mxu1 }
 0x387   : > { %v767_v56 = vadd.f32 %v2712_v54, %v766_v55  ;;  %v2961_v57 = vpop.f32.mrb[1].mxu1 }
 0x388   : > { %v769_v58 = vpop.f32.mrb[2].mxu1 }
 0x389   : > { %v3636_v59 = vpack.c.bf16 %v767_v56, %v767_v56  ;;  %v2962_v60 = vpop.f32.mrb[3].mxu1 }
 0x38b   : > { %774 = vrot.lane.b32.xlu1 %v3636_v59, %s3395_s29 }
 0x3fd   : > { %v775_v61 = vpop.permute.xlu1 %774 }
 0x3fe   : > { %v781_v62 = vsel %vm776_vm3, %v775_v61, 0 }
 0x3ff   : > { %2964 = vmatpush3.bf16.xpose.msra.mxu1 %v781_v62 }
 0x400   : > { %2969 = vmatprep.subr.bf16.mxu1 %v3393_v14 }
 0x406   : > { %2966 = vmatmul.mubr.msk.bf16.vlgmr.msra.gmra.mrb[4].mxu1 %vm776_vm3, %v3636_v59 }
 0x407   : > { %2971 = vmatprep.mubr.msk.bf16.mxu1 %vm3392_vm0, %v3393_v14 }
 0x4d9   : > { %v817_v2 = vpop.f32.mrb[4].mxu1 }
 0x4da   : > { %v818_v3 = vadd.f32 %v817_v2, %v3646_v1  ;;  %v2967_v4 = vpop.f32.mrb[5].mxu1 }
 0x4db   : > { %v820_v5 = vpop.f32.mrb[6].mxu1 }
 0x4dc   : > { %v2968_v6 = vpop.f32.mrb[7].mxu1  ;;  %v823_v7 = vsel %vm776_vm3, %v818_v3, -inf }
 0x4dd   : > { %824 = vmax.xlane.f32.xlu1 %v823_v7 }
 0x4ee   : > { %887 = vrot.lane.b32.xlu1 %v3636_v59, %s3397_s30 }
 0x56a   : > { %v825_v8 = vpop.xlane.xlu1 %824 }
 0x56b   : > { %v826_v9 = vsub.f32 %v818_v3, %v825_v8 }
 0x56d   : > { %v827_v10 = vmul.f32 1.442695, %v826_v9 }
 0x56e   : > { %v888_v19 = vpop.permute.xlu1 %887 }
 0x56f   : > { %3288 = vpow2.f32 %v827_v10  ;;  %v893_v21 = vsel %vm776_vm3, %v888_v19, 0 }
 0x579   : > { %v3289_v11 = vpop.eup %3288 }
 0x57a   : > { %v829_v12 = vsel %vm776_vm3, %v3289_v11, 0.0 }
 0x57b   : > { %830 = vadd.xlane.f32.xlu0 %v829_v12 }
 0x591   : > { %835 = vrot.lane.b32.xlu0 %v3636_v59, %s3398_s18 }
 0x595   : > { %885 = vrot.lane.b32.xlu0 %v3636_v59, %s3399_s26 }
 0x608   : > { %v831_v13 = vpop.xlane.xlu0 %830 }
 0x609   : > { %3290 = vrcp.f32 %v831_v13 }
 0x60c   : > { %v836_v15 = vpop.permute.xlu0 %835 }
 0x60d   : > { %v842_v16 = vsel %vm840_vm5, %v836_v15, 0 }
 0x60e   : > { %2970 = vmatpush3.bf16.msra.mxu1 %v842_v16 }
 0x60f   : > { %2975 = vmatprep.subr.bf16.mxu1 %v3393_v14 }
 0x610   : > { %v886_v22 = vpop.permute.xlu0 %885 }
 0x613   : > { %v3291_v17 = vpop.eup %3290 }
 0x614   : > { %v833_v18 = vmul.f32 %v3291_v17, %v3289_v11 }
 0x616   : > { %v834_v20 = vpack.c.bf16 %v833_v18, %v833_v18 }
 0x618   : > { %2972 = vmatmul.mubr.msk.bf16.vlgmr.msra.gmra.mrb[8].mxu1 %vm776_vm3, %v834_v20 }
 0x619   : > { %2976 = vmatpush3.bf16.xpose.msra.mxu1 %v893_v21  ;;  %2977 = vmatprep.mubr.msk.bf16.mxu1 %vm3392_vm0, %v3393_v14 }
 0x61a   : > { %2981 = vmatprep.subr.bf16.mxu1 %v3393_v14 }
 0x620   : > { %2978 = vmatmul.mubr.msk.bf16.vlgmr.msra.gmra.mrb[12].mxu1 %vm776_vm3, %v886_v22 }
 0x621   : > { %2983 = vmatprep.mubr.msk.bf16.mxu1 %vm3392_vm0, %v3393_v14 }
 0x6eb   : > { %v878_v25 = vpop.f32.mrb[8].mxu1 }
 0x6ec   : > { %v884_v26 = vpack.c.bf16 %v878_v25, %v878_v25  ;;  %v2973_v27 = vpop.f32.mrb[9].mxu1 }
 0x6ed   : > { %v881_v28 = vpop.f32.mrb[10].mxu1 }
 0x6ee   : > { %v2974_v29 = vpop.f32.mrb[11].mxu1  ;;  %2996 = vmatmul.mubr.msk.bf16.vlgmr.msra.gmra.mrb[4].mxu0 %vm776_vm3, %v884_v26  ;;  %v652_v26 = vld [vmem:[%s4086_s7 + $0x8] sm:$0xf] }
 0x6ef   : > { %3007 = vmatprep.mubr.msk.bf16.mxu0 %vm3392_vm0, %v3393_v14  ;;  %v1203_v27 = vsel %vm840_vm5, %v652_v26, 0  ;;  %v2729_v26 = vld [vmem:[%s4090_s11] ss:$0 sm:$0xff] }
 0x6f3   : > { %v929_v30 = vpop.f32.mrb[12].mxu1 }
 0x6f4   : > { %v930_v31 = vadd.f32 %v929_v30, %v3646_v1  ;;  %v2979_v32 = vpop.f32.mrb[13].mxu1 }
 0x6f5   : > { %v932_v33 = vpop.f32.mrb[14].mxu1 }
 0x6f6   : > { %v2980_v35 = vpop.f32.mrb[15].mxu1  ;;  %v935_v36 = vsel %vm776_vm3, %v930_v31, -inf }
 0x6f7   : > { %936 = vmax.xlane.f32.xlu0 %v935_v36 }
 0x70d   : > { %947 = vrot.lane.b32.xlu0 %v3636_v59, %s4109_s22 }
 0x711   : > { %1088 = vrot.lane.b32.xlu0 %v3636_v59, %s4107_s24 }
 0x784   : > { %v937_v37 = vpop.xlane.xlu0 %936 }
 0x785   : > { %v938_v38 = vsub.f32 %v930_v31, %v937_v37 }
 0x787   : > { %v939_v39 = vmul.f32 1.442695, %v938_v38 }
 0x788   : > { %v948_v40 = vpop.permute.xlu0 %947 }
 0x789   : > { %3292 = vpow2.f32 %v939_v39  ;;  %v953_v41 = vsel %vm840_vm5, %v948_v40, 0 }
 0x78a   : > { %2982 = vmatpush3.bf16.msra.mxu1 %v953_v41 }
 0x78b   : > { %2987 = vmatprep.subr.bf16.mxu1 %v3393_v14 }
 0x78c   : > { %v1089_v62 = vpop.permute.xlu0 %1088 }
 0x793   : > { %v3293_v42 = vpop.eup %3292 }
 0x794   : > { %v941_v43 = vsel %vm776_vm3, %v3293_v42, 0.0 }
 0x795   : > { %942 = vadd.xlane.f32.xlu1 %v941_v43 }
 0x7a6   : > { %1090 = vrot.lane.b32.xlu1 %v3636_v59, %s4108_s27 }
 0x7c1   : > { %v1082_v44 = vpop.f32.mrb[4].mxu0 }
 0x7c2   : > { %v2997_v45 = vpop.f32.mrb[5].mxu0 }
 0x7c3   : > { %v1085_v46 = vpop.f32.mrb[6].mxu0 }
 0x7c4   : > { %v2998_v47 = vpop.f32.mrb[7].mxu0 }
 0x7c5   : > { %v653_v47 = vld [vmem:[%s4086_s7 + $0xc] sm:$0xf] }
 0x822   : > { %v943_v48 = vpop.xlane.xlu1 %942 }
 0x823   : > { %3294 = vrcp.f32 %v943_v48 }
 0x826   : > { %v1091_v54 = vpop.permute.xlu1 %1090 }
 0x827   : > { %v1096_v60 = vsel %vm776_vm3, %v1091_v54, 0 }
 0x82d   : > { %v3295_v49 = vpop.eup %3294 }
 0x82e   : > { %v945_v51 = vmul.f32 %v3295_v49, %v3293_v42 }
 0x830   : > { %v946_v52 = vpack.c.bf16 %v945_v51, %v945_v51 }
 0x832   : > { %2984 = vmatmul.mubr.msk.bf16.vlgmr.msra.gmra.mrb[16].mxu1 %vm776_vm3, %v946_v52 }
 0x833   : > { %2988 = vmatpush3.bf16.msra.mxu1 %v1000_v53  ;;  %2989 = vmatprep.mubr.msk.bf16.mxu1 %vm3392_vm0, %v3393_v14 }
 0x834   : > { %2999 = vmatprep.subr.bf16.mxu1 %v3393_v14 }
 0x905   : > { %v989_v55 = vpop.f32.mrb[16].mxu1 }
 0x906   : > { %v995_v56 = vpack.c.bf16 %v989_v55, %v989_v55  ;;  %v2985_v57 = vpop.f32.mrb[17].mxu1 }
 0x907   : > { %v992_v58 = vpop.f32.mrb[18].mxu1 }
 0x908   : > { %v2986_v61 = vpop.f32.mrb[19].mxu1  ;;  %2990 = vmatmul.mubr.msk.bf16.vlgmr.msra.gmra.mrb[20].mxu1 %vm776_vm3, %v995_v56 }
 0x909   : > { %3000 = vmatpush3.bf16.xpose.msra.mxu1 %v1096_v60  ;;  %3001 = vmatprep.mubr.msk.bf16.mxu1 %vm3392_vm0, %v3393_v14 }
 0x90a   : > { %3011 = vmatprep.subr.bf16.mxu1 %v3393_v14 }
 0x910   : > { %3002 = vmatmul.mubr.msk.bf16.vlgmr.msra.gmra.mrb[24].mxu1 %vm776_vm3, %v1089_v62 }
 0x911   : > { %3013 = vmatprep.mubr.msk.bf16.mxu1 %vm3392_vm0, %v3393_v14  ;;  %3012 = vmatpush3.bf16.msra.mxu1 %v1203_v27 }
 0x912   : > { %3023 = vmatprep.subr.bf16.mxu1 %v3393_v14 }
 0x9db   : > { %v1036_v63 = vpop.f32.mrb[20].mxu1 }
 0x9dc   : > { %v3702_v0 = vadd.f32 %v1082_v44, %v1036_v63  ;;  %v2991_v2 = vpop.f32.mrb[21].mxu1 }
 0x9dd   : > { %v1039_v3 = vpop.f32.mrb[22].mxu1 }
 0x9de   : > { %v2992_v4 = vpop.f32.mrb[23].mxu1  ;;  %v2728_v3 = vld [vmem:[%s4087_s8] ss:$0 sm:$0xff] }
 0x9e3   : > { %v1132_v5 = vpop.f32.mrb[24].mxu1 }
 0x9e4   : > { %v1133_v6 = vadd.f32 %v1132_v5, %v3646_v1  ;;  %v3003_v7 = vpop.f32.mrb[25].mxu1 }
 0x9e5   : > { %v1135_v8 = vpop.f32.mrb[26].mxu1 }
 0x9e6   : > { %v3004_v9 = vpop.f32.mrb[27].mxu1  ;;  %v1138_v10 = vsel %vm776_vm3, %v1133_v6, -inf }
 0x9e7   : > { %1139 = vmax.xlane.f32.xlu0 %v1138_v10 }
 0x9fd   : > { %1150 = vrot.lane.b32.xlu0 %v3636_v59, %s4106_s23  ;;  %s2819_s23 = sshll.u32 %s3519_s28, 7 }
 0x9fe   : > { %s4037_s24 = scalar_lea.hbm %s4096_s17, %s2819_s23 }
 0xa01   : > { %1246 = vrot.lane.b32.xlu0 %v3636_v59, %s4103_s19 }
 0xa74   : > { %v1140_v11 = vpop.xlane.xlu0 %1139 }
 0xa75   : > { %v1141_v12 = vsub.f32 %v1133_v6, %v1140_v11 }
 0xa77   : > { %v1142_v13 = vmul.f32 1.442695, %v1141_v12 }
 0xa78   : > { %v1151_v15 = vpop.permute.xlu0 %1150 }
 0xa79   : > { %3296 = vpow2.f32 %v1142_v13  ;;  %v1156_v16 = vsel %vm840_vm5, %v1151_v15, 0  ;;  %v3262_v15 = vld [vmem:[%s4092_s13] sm:$0xff]  }
 0xa7a   : > { %3006 = vmatpush3.bf16.msra.mxu0 %v1156_v16  ;;  %v3264_v16 = vld [vmem:[%s4094_s15] sm:$0xff]  }
 0xa7b   : > { %3017 = vmatprep.subr.bf16.mxu0 %v3393_v14 }
 0xa7c   : > { %v1247_v25 = vpop.permute.xlu0 %1246 }
 0xa83   : > { %v3297_v17 = vpop.eup %3296 }
 0xa84   : > { %v1144_v18 = vsel %vm776_vm3, %v3297_v17, 0.0 }
 0xa85   : > { %1145 = vadd.xlane.f32.xlu1 %v1144_v18  ;;  %v3266_v18 = vld [vmem:[%s4094_s15 + $0x10] sm:$0xff]  }
 0xa96   : > { %1248 = vrot.lane.b32.xlu1 %v3636_v59, %s4105_s0  ;;  %s4125_s0 = smov 48  }
 0xb12   : > { %v1146_v19 = vpop.xlane.xlu1 %1145 }
 0xb13   : > { %3298 = vrcp.f32 %v1146_v19  ;;  %v3267_v19 = vld [vmem:[%s4094_s15 + $0x18] sm:$0xff]  }
 0xb16   : > { %v1249_v22 = vpop.permute.xlu1 %1248 }
 0xb17   : > { %v1254_v24 = vsel %vm776_vm3, %v1249_v22, 0 }
 0xb1d   : > { %v3299_v20 = vpop.eup %3298 }
 0xb1e   : > { %v1148_v21 = vmul.f32 %v3299_v20, %v3297_v17  ;;  %v3265_v17 = vld [vmem:[%s4094_s15 + $0x8] sm:$0xff]   ;;  %v3268_v20 = vld [vmem:[%s4094_s15 + $0x20] sm:$0xff]  }
 0xb20   : > { %v1149_v23 = vpack.c.bf16 %v1148_v21, %v1148_v21  ;;  %v3269_v21 = vld [vmem:[%s4094_s15 + $0x28] sm:$0xff]  }
 0xb22   : > { %3008 = vmatmul.mubr.msk.bf16.vlgmr.msra.gmra.mrb[8].mxu0 %vm776_vm3, %v1149_v23 }
 0xb23   : > { %3018 = vmatpush3.bf16.xpose.msra.mxu0 %v1254_v24  ;;  %3019 = vmatprep.mubr.msk.bf16.mxu0 %vm3392_vm0, %v3393_v14 }
 0xb24   : > { %3029 = vmatprep.subr.bf16.mxu0 %v3393_v14 }
 0xb2a   : > { %3020 = vmatmul.mubr.msk.bf16.vlgmr.msra.gmra.mrb[12].mxu0 %vm776_vm3, %v1247_v25 }
 0xb2b   : > { %3031 = vmatprep.mubr.msk.bf16.mxu0 %vm3392_vm0, %v3393_v14 }
 0xbf5   : > { %v1192_v28 = vpop.f32.mrb[8].mxu0 }
 0xbf6   : > { %v1198_v29 = vpack.c.bf16 %v1192_v28, %v1192_v28  ;;  %v3009_v30 = vpop.f32.mrb[9].mxu0  ;;  %v2730_v28 = vld [vmem:[%s4091_s12] ss:$0 sm:$0xff] }
 0xbf7   : > { %v1195_v31 = vpop.f32.mrb[10].mxu0 }
 0xbf8   : > { %v3010_v32 = vpop.f32.mrb[11].mxu0  ;;  %3014 = vmatmul.mubr.msk.bf16.vlgmr.msra.gmra.mrb[28].mxu1 %vm776_vm3, %v1198_v29 }
 0xbf9   : > { %3025 = vmatprep.mubr.msk.bf16.mxu1 %vm3392_vm0, %v3393_v14  ;;  %v3270_v32 = vld [vmem:[%s4094_s15 + $0x30] sm:$0xff]  }
 0xbfd   : > { %v1290_v33 = vpop.f32.mrb[12].mxu0 }
 0xbfe   : > { %v1291_v35 = vadd.f32 %v1290_v33, %v3646_v1  ;;  %v3021_v36 = vpop.f32.mrb[13].mxu0  ;;  %v3271_v33 = vld [vmem:[%s4094_s15 + $0x38] sm:$0xff]  }
 0xbff   : > { %v1293_v37 = vpop.f32.mrb[14].mxu0 }
 0xc00   : > { %v3022_v38 = vpop.f32.mrb[15].mxu0  ;;  %v1296_v39 = vsel %vm776_vm3, %v1291_v35, -inf }
 0xc01   : > { %1297 = vmax.xlane.f32.xlu0 %v1296_v39 }
 0xc17   : > { %1308 = vrot.lane.b32.xlu0 %v3636_v59, %s4104_s20  ;;  %v1361_v59 = vsel %vm840_vm5, %v653_v47, 0  ;;  %s4126_s20 = smov 72  }
 0xc18   : > { %3030 = vmatpush3.bf16.msra.mxu0 %v1361_v59 }
 0xc19   : > { %3043 = vmatprep.subr.bf16.mxu0 %v3393_v14 }
 0xc8e   : > { %v1298_v40 = vpop.xlane.xlu0 %1297 }
 0xc8f   : > { %v1299_v41 = vsub.f32 %v1291_v35, %v1298_v40  ;;  %v2731_v35 = vld [vmem:[%s4093_s14] ss:$0 sm:$0xff] }
 0xc91   : > { %v1300_v42 = vmul.f32 1.442695, %v1299_v41 }
 0xc92   : > { %v1309_v43 = vpop.permute.xlu0 %1308 }
 0xc93   : > { %3300 = vpow2.f32 %v1300_v42  ;;  %v1314_v44 = vsel %vm840_vm5, %v1309_v43, 0  ;;  %v2743_v43 = vld [vmem:[%s4095_s16] ss:$0 sm:$0xff] }
 0xc94   : > { %3024 = vmatpush3.bf16.msra.mxu1 %v1314_v44 }
 0xc95   : > { %3035 = vmatprep.subr.bf16.mxu1 %v3393_v14 }
 0xc9d   : > { %v3301_v45 = vpop.eup %3300 }
 0xc9e   : > { %v1302_v46 = vsel %vm776_vm3, %v3301_v45, 0.0 }
 0xc9f   : > { %1303 = vadd.xlane.f32.xlu1 %v1302_v46 }
 0xccb   : > { %v1239_v48 = vpop.f32.mrb[28].mxu1 }
 0xccc   : > { %v1245_v49 = vadd.f32 %v1239_v48, %v3702_v0  ;;  %v3015_v50 = vpop.f32.mrb[29].mxu1 }
 0xccd   : > { %v1242_v51 = vpop.f32.mrb[30].mxu1 }
 0xcce   : > { %v3016_v52 = vpop.f32.mrb[31].mxu1 }
 0xd2c   : > { %v1304_v53 = vpop.xlane.xlu1 %1303 }
 0xd2d   : > { %3302 = vrcp.f32 %v1304_v53 }
 0xd37   : > { %v3303_v54 = vpop.eup %3302 }
 0xd38   : > { %v1306_v55 = vmul.f32 %v3303_v54, %v3301_v45 }
 0xd3a   : > { %v1307_v56 = vpack.c.bf16 %v1306_v55, %v1306_v55  ;;  %v3272_v55 = vld [vmem:[%s4084_s5 + $0x10] sm:$0xff]  }
 0xd3c   : > { %3026 = vmatmul.mubr.msk.bf16.vlgmr.msra.gmra.mrb[32].mxu1 %vm776_vm3, %v1307_v56  ;;  %v3273_v56 = vld [vmem:[%s4084_s5 + $0x18] sm:$0xff]  }
 0xd3d   : > { %3039 = vmatprep.mubr.msk.bf16.mxu1 %vm3392_vm0, %v3393_v14  ;;  %3036 = vmatpush3.bf16.msra.mxu1 %v3262_v15 }
 0xd3e   : > { %3037 = vmatprep.subr.bf16.mxu1 %v3393_v14 }
 0xe0f   : > { %v1350_v57 = vpop.f32.mrb[32].mxu1 }
 0xe10   : > { %v1356_v58 = vpack.c.bf16 %v1350_v57, %v1350_v57  ;;  %v3027_v60 = vpop.f32.mrb[33].mxu1 }
 0xe11   : > { %v1353_v61 = vpop.f32.mrb[34].mxu1 }
 0xe12   : > { %v3028_v62 = vpop.f32.mrb[35].mxu1  ;;  %3032 = vmatmul.mubr.msk.bf16.vlgmr.msra.gmra.mrb[16].mxu0 %vm776_vm3, %v1356_v58 }
 0xe13   : > { %3059 = vmatprep.mubr.msk.bf16.mxu0 %vm3392_vm0, %v3393_v14  ;;  %3044 = vmatpush3.bf16.msra.mxu0 %v3264_v16  ;;  %v2780_v62 = vld [vmem:[%s4088_s9 + $0x1] ss:$0 sm:$0xff] }
 0xe14   : > { %3045 = vmatprep.subr.bf16.mxu0 %v3393_v14 }
 0xe17   : > { %3046 = vmatpush3.bf16.msra.mxu0 %v3265_v17 }
 0xe18   : > { %3047 = vmatprep.subr.bf16.mxu0 %v3393_v14 }
 0xe1b   : > { %3048 = vmatpush3.bf16.msra.mxu0 %v3266_v18 }
 0xe1c   : > { %3049 = vmatprep.subr.bf16.mxu0 %v3393_v14 }
 0xe1f   : > { %3050 = vmatpush3.bf16.msra.mxu0 %v3267_v19 }
 0xe20   : > { %3051 = vmatprep.subr.bf16.mxu0 %v3393_v14 }
 0xe23   : > { %3052 = vmatpush3.bf16.msra.mxu0 %v3268_v20 }
 0xe24   : > { %3053 = vmatprep.subr.bf16.mxu0 %v3393_v14 }
 0xe27   : > { %3054 = vmatpush3.bf16.msra.mxu0 %v3269_v21 }
 0xe28   : > { %3055 = vmatprep.subr.bf16.mxu0 %v3393_v14 }
 0xe2b   : > { %3056 = vmatpush3.bf16.msra.mxu0 %v3270_v32 }
 0xe2c   : > { %3057 = vmatprep.subr.bf16.mxu0 %v3393_v14 }
 0xe2f   : > { %3058 = vmatpush3.bf16.msra.mxu0 %v3271_v33 }
 0xe30   : > { %3089 = vmatprep.subr.bf16.mxu0 %v3393_v14 }
 0xee5   : > { %v1397_v63 = vpop.f32.mrb[16].mxu0 }
 0xee6   : > { %v1403_v0 = vadd.f32 %v1397_v63, %v1245_v49  ;;  %v3033_v2 = vpop.f32.mrb[17].mxu0 }
 0xee7   : > { %v1400_v4 = vpop.f32.mrb[18].mxu0 }
 0xee8   : > { %v1404_v5 = vadd.f32 %v1403_v0, %v3610_v34  ;;  %v3034_v6 = vpop.f32.mrb[19].mxu0  ;;  %v3263_v34 = vld [vmem:[%s4092_s13 + $0x8] sm:$0xff]   ;;  %v2781_v0 = vld [vmem:[%s4089_s10 + $0x1] ss:$0 sm:$0xff] }
 0xee9   : > { %3038 = vmatpush3.bf16.msra.mxu1 %v3263_v34 }
 0xeea   : > { %v3754_v7 = vadd.f32 %v2728_v3, %v1404_v5  ;;  %3063 = vmatprep.subr.bf16.mxu1 %v3393_v14  ;;  %v2782_v5 = vld [vmem:[%s4085_s6 + $0x1] ss:$0 sm:$0xff] }
 0xeec   : > { %v1412_v8 = vsel %vm681_vm2, %v3754_v7, 0.0 }
 0xeed   : > { %1413 = vadd.xlane.f32.xlu1 %v1412_v8 }
 0xf7a   : > { %v1414_v9 = vpop.xlane.xlu1 %1413 }
 0xf7b   : > { %v1415_v10 = vmul.f32 0.03125, %v1414_v9 }
 0xf7d   : > { %v1416_v11 = vsub.f32 %v3754_v7, %v1415_v10 }
 0xf7f   : > { %v1417_v12 = vmul.f32 %v1416_v11, %v1416_v11 }
 0xf81   : > { %v1418_v13 = vsel %vm681_vm2, %v1417_v12, 0.0 }
 0xf82   : > { %1419 = vadd.xlane.f32.xlu1 %v1418_v13 }
0x100f   : > { %v1420_v22 = vpop.xlane.xlu1 %1419 }
0x1010   : > { %v1421_v23 = vmul.f32 0.03125, %v1420_v22 }
0x1012   : > { %v1422_v24 = vadd.f32 1e-05, %v1421_v23 }
0x1014   : > { %3304 = vrsqrt.f32 %v1422_v24 }
0x101e   : > { %v3305_v25 = vpop.eup %3304 }
0x101f   : > { %v1424_v27 = vmul.f32 %v3305_v25, %v1416_v11 }
0x1021   : > { %v1431_v29 = vmul.f32 %v2729_v26, %v1424_v27 }
0x1023   : > { %v1438_v30 = vadd.f32 %v2730_v28, %v1431_v29 }
0x1025   : > { %v1439_v31 = vpack.c.bf16 %v1438_v30, %v1438_v30 }
0x1027   : > { %3040 = vmatmul.mubr.msk.bf16.vlgmr.msra.gmra.mrb[36].mxu1 %vm681_vm2, %v1439_v31 }
0x1028   : > { %3067 = vmatprep.mubr.msk.bf16.mxu1 %vm3392_vm0, %v3393_v14  ;;  %3064 = vmatpush3.bf16.msra.mxu1 %v3272_v55 }
0x1029   : > { %3065 = vmatprep.subr.bf16.mxu1 %v3393_v14 }
0x102c   : > { %3066 = vmatpush3.bf16.msra.mxu1 %v3273_v56  ;;  %v2749_v56 = vld [vmem:[%s4086_s7 + $0x10] sm:$0xf] }
0x102d   : > { %3071 = vmatprep.subr.bf16.mxu1 %v3393_v14 }
0x10fa   : > { %v1495_v36 = vpop.f32.mrb[36].mxu1 }
0x10fb   : > { %v1496_v37 = vadd.f32 %v2731_v35, %v1495_v36  ;;  %v3041_v38 = vpop.f32.mrb[37].mxu1 }
0x10fc   : > { %v1498_v39 = vpop.f32.mrb[38].mxu1 }
0x10fd   : > { %v1501_v40 = vmax.f32 %v1496_v37, 0.0  ;;  %v3042_v41 = vpop.f32.mrb[39].mxu1 }
0x10ff   : > { %v1502_v42 = vpack.c.bf16 %v1501_v40, %v1501_v40 }
0x1101   : > { %3060 = vmatmul.mubr.bf16.vlgmr.msra.gmra.mrb[20].mxu0 %v1502_v42 }
0x1102   : > { %3091 = vmatprep.mubr.msk.bf16.mxu0 %vm3392_vm0, %v3393_v14 }
0x11d4   : > { %v1585_v44 = vpop.f32.mrb[20].mxu0 }
0x11d5   : > { %v1591_v45 = vadd.f32 %v1585_v44, %v3754_v7  ;;  %v3061_v46 = vpop.f32.mrb[21].mxu0 }
0x11d6   : > { %v1588_v47 = vpop.f32.mrb[22].mxu0 }
0x11d7   : > { %v3818_v59 = vadd.f32 %v2743_v43, %v1591_v45  ;;  %v3062_v48 = vpop.f32.mrb[23].mxu0 }
0x11d9   : > { %v1647_v49 = vsel %vm681_vm2, %v3818_v59, 0.0 }
0x11da   : > { %1648 = vadd.xlane.f32.xlu1 %v1647_v49 }
0x1267   : > { %v1649_v50 = vpop.xlane.xlu1 %1648 }
0x1268   : > { %v1650_v51 = vmul.f32 0.03125, %v1649_v50  ;;  %v2750_v50 = vld [vmem:[%s4086_s7 + $0x14] sm:$0xf] }
0x126a   : > { %v1651_v52 = vsub.f32 %v3818_v59, %v1650_v51  ;;  %v1962_v51 = vsel %vm840_vm5, %v2750_v50, 0 }
0x126c   : > { %v1652_v53 = vmul.f32 %v1651_v52, %v1651_v52 }
0x126e   : > { %v1653_v54 = vsel %vm681_vm2, %v1652_v53, 0.0 }
0x126f   : > { %1654 = vadd.xlane.f32.xlu1 %v1653_v54 }
0x12fc   : > { %v1655_v57 = vpop.xlane.xlu1 %1654 }
0x12fd   : > { %v1656_v58 = vmul.f32 0.03125, %v1655_v57 }
0x12ff   : > { %v1657_v60 = vadd.f32 1e-05, %v1656_v58 }
0x1301   : > { %3306 = vrsqrt.f32 %v1657_v60  ;;  %v2008_v60 = vsel %vm840_vm5, %v2749_v56, 0 }
0x130b   : > { %v3307_v61 = vpop.eup %3306 }
0x130c   : > { %v1659_v63 = vmul.f32 %v3307_v61, %v1651_v52 }
0x130e   : > { %v1666_v2 = vmul.f32 %v2780_v62, %v1659_v63 }
0x1310   : > { %v1673_v3 = vadd.f32 %v2781_v0, %v1666_v2 }
0x1312   : > { %v1674_v4 = vpack.c.bf16 %v1673_v3, %v1673_v3 }
0x1314   : > { %3068 = vmatmul.mubr.msk.bf16.vlgmr.msra.gmra.mrb[40].mxu1 %vm681_vm2, %v1674_v4 }
0x1315   : > { %3073 = vmatprep.mubr.msk.bf16.mxu1 %vm3392_vm0, %v3393_v14 }
0x13e7   : > { %v1730_v6 = vpop.f32.mrb[40].mxu1 }
0x13e8   : > { %v1731_v7 = vadd.f32 %v2782_v5, %v1730_v6  ;;  %v3069_v8 = vpop.f32.mrb[41].mxu1 }
0x13e9   : > { %v1733_v9 = vpop.f32.mrb[42].mxu1 }
0x13ea   : > { %v3844_v10 = vpack.c.bf16 %v1731_v7, %v1731_v7  ;;  %v3070_v11 = vpop.f32.mrb[43].mxu1 }
0x13ec   : > { %1738 = vrot.lane.b32.xlu0 %v3844_v10, %s3395_s29  ;;  %s4122_s29 = smov 56  }
0x145e   : > { %v1739_v12 = vpop.permute.xlu0 %1738 }
0x145f   : > { %v1744_v13 = vsel %vm776_vm3, %v1739_v12, 0 }
0x1460   : > { %3072 = vmatpush3.bf16.xpose.msra.mxu1 %v1744_v13 }
0x1461   : > { %3077 = vmatprep.subr.bf16.mxu1 %v3393_v14 }
0x1467   : > { %3074 = vmatmul.mubr.msk.bf16.vlgmr.msra.gmra.mrb[44].mxu1 %vm776_vm3, %v3844_v10 }
0x1468   : > { %3079 = vmatprep.mubr.msk.bf16.mxu1 %vm3392_vm0, %v3393_v14 }
0x153a   : > { %v1780_v15 = vpop.f32.mrb[44].mxu1 }
0x153b   : > { %v1781_v34 = vadd.f32 %v1780_v15, %v3646_v1  ;;  %v3075_v16 = vpop.f32.mrb[45].mxu1 }
0x153c   : > { %v1783_v17 = vpop.f32.mrb[46].mxu1 }
0x153d   : > { %v3076_v18 = vpop.f32.mrb[47].mxu1  ;;  %v1786_v19 = vsel %vm776_vm3, %v1781_v34, -inf }
0x153e   : > { %1787 = vmax.xlane.f32.xlu1 %v1786_v19 }
0x154f   : > { %1798 = vrot.lane.b32.xlu1 %v3844_v10, %s3398_s18  ;;  %s4124_s18 = smov 112  }
0x1553   : > { %1849 = vrot.lane.b32.xlu1 %v3844_v10, %s3397_s30  ;;  %s4123_s30 = smov 80  }
0x1557   : > { %1847 = vrot.lane.b32.xlu1 %v3844_v10, %s3399_s26 }
0x15cb   : > { %v1788_v20 = vpop.xlane.xlu1 %1787 }
0x15cc   : > { %v1789_v21 = vsub.f32 %v1781_v34, %v1788_v20 }
0x15ce   : > { %v1790_v22 = vmul.f32 1.442695, %v1789_v21 }
0x15cf   : > { %v1799_v23 = vpop.permute.xlu1 %1798 }
0x15d0   : > { %3308 = vpow2.f32 %v1790_v22  ;;  %v1804_v24 = vsel %vm840_vm5, %v1799_v23, 0 }
0x15d1   : > { %3078 = vmatpush3.bf16.msra.mxu1 %v1804_v24 }
0x15d2   : > { %3083 = vmatprep.subr.bf16.mxu1 %v3393_v14 }
0x15d3   : > { %v1850_v30 = vpop.permute.xlu1 %1849 }
0x15d4   : > { %v1855_v32 = vsel %vm776_vm3, %v1850_v30, 0 }
0x15d7   : > { %v1848_v33 = vpop.permute.xlu1 %1847 }
0x15da   : > { %v3309_v25 = vpop.eup %3308 }
0x15db   : > { %v1792_v26 = vsel %vm776_vm3, %v3309_v25, 0.0 }
0x15dc   : > { %1793 = vadd.xlane.f32.xlu0 %v1792_v26 }
0x1669   : > { %v1794_v27 = vpop.xlane.xlu0 %1793 }
0x166a   : > { %3310 = vrcp.f32 %v1794_v27 }
0x1674   : > { %v3311_v28 = vpop.eup %3310 }
0x1675   : > { %v1796_v29 = vmul.f32 %v3311_v28, %v3309_v25 }
0x1677   : > { %v1797_v31 = vpack.c.bf16 %v1796_v29, %v1796_v29 }
0x1679   : > { %3080 = vmatmul.mubr.msk.bf16.vlgmr.msra.gmra.mrb[48].mxu1 %vm776_vm3, %v1797_v31 }
0x167a   : > { %3084 = vmatpush3.bf16.xpose.msra.mxu1 %v1855_v32  ;;  %3085 = vmatprep.mubr.msk.bf16.mxu1 %vm3392_vm0, %v3393_v14 }
0x167b   : > { %3095 = vmatprep.subr.bf16.mxu1 %v3393_v14 }
0x1681   : > { %3086 = vmatmul.mubr.msk.bf16.vlgmr.msra.gmra.mrb[52].mxu1 %vm776_vm3, %v1848_v33 }
0x1682   : > { %3097 = vmatprep.mubr.msk.bf16.mxu1 %vm3392_vm0, %v3393_v14  ;;  %3096 = vmatpush3.bf16.msra.mxu1 %v1962_v51 }
0x1683   : > { %3107 = vmatprep.subr.bf16.mxu1 %v3393_v14 }
0x174c   : > { %v1840_v35 = vpop.f32.mrb[48].mxu1 }
0x174d   : > { %v3081_v36 = vpop.f32.mrb[49].mxu1  ;;  %v1846_v61 = vpack.c.bf16 %v1840_v35, %v1840_v35 }
0x174e   : > { %v1843_v37 = vpop.f32.mrb[50].mxu1 }
0x174f   : > { %v3082_v38 = vpop.f32.mrb[51].mxu1 }
0x1750   : > { %v2751_v38 = vld [vmem:[%s4086_s7 + $0x18] sm:$0xf] }
0x1754   : > { %v1891_v39 = vpop.f32.mrb[52].mxu1 }
0x1755   : > { %v1892_v40 = vadd.f32 %v1891_v39, %v3646_v1  ;;  %v3087_v41 = vpop.f32.mrb[53].mxu1  ;;  %v2165_v39 = vsel %vm840_vm5, %v2751_v38, 0 }
0x1756   : > { %v1894_v42 = vpop.f32.mrb[54].mxu1 }
0x1757   : > { %v3088_v43 = vpop.f32.mrb[55].mxu1  ;;  %v1897_v44 = vsel %vm776_vm3, %v1892_v40, -inf }
0x1758   : > { %1898 = vmax.xlane.f32.xlu1 %v1897_v44 }
0x17e5   : > { %v1899_v45 = vpop.xlane.xlu1 %1898 }
0x17e6   : > { %v1900_v46 = vsub.f32 %v1892_v40, %v1899_v45 }
0x17e8   : > { %v1901_v47 = vmul.f32 1.442695, %v1900_v46 }
0x17ea   : > { %3312 = vpow2.f32 %v1901_v47 }
0x17f4   : > { %v3313_v48 = vpop.eup %3312 }
0x17f5   : > { %v1903_v49 = vsel %vm776_vm3, %v3313_v48, 0.0 }
0x17f6   : > { %1904 = vadd.xlane.f32.xlu0 %v1903_v49 }
0x180c   : > { %1909 = vrot.lane.b32.xlu0 %v3844_v10, %s4122_s29  ;;  %s4128_s29 = smov 40  }
0x1810   : > { %2052 = vrot.lane.b32.xlu0 %v3844_v10, %s4123_s30  ;;  %s537_s30 = sand.u32 1, %s3380_s25  }
0x1811   : > { %s2630_s22 = scalar_lea.sflag [#allocation3], %s537_s30 }
0x1814   : > { %2050 = vrot.lane.b32.xlu0 %v3844_v10, %s4124_s18  ;;  %s2706_s18 = sshll.u32 %s537_s30, 3 }
0x1815   : > { %s539_s19 = scalar_lea.vmem [#allocation2], %s2706_s18 }
0x1883   : > { %v1905_v52 = vpop.xlane.xlu0 %1904 }
0x1884   : > { %3314 = vrcp.f32 %v1905_v52 }
0x1887   : > { %v1910_v53 = vpop.permute.xlu0 %1909 }
0x1888   : > { %v1915_v54 = vsel %vm840_vm5, %v1910_v53, 0 }
0x1889   : > { %3090 = vmatpush3.bf16.msra.mxu0 %v1915_v54 }
0x188a   : > { %3101 = vmatprep.subr.bf16.mxu0 %v3393_v14 }
0x188b   : > { %v2053_v62 = vpop.permute.xlu0 %2052 }
0x188c   : > { %v2058_v4 = vsel %vm776_vm3, %v2053_v62, 0 }
0x188e   : > { %v3315_v55 = vpop.eup %3314 }
0x188f   : > { %v1907_v57 = vmul.f32 %v3315_v55, %v3313_v48  ;;  %v2051_v8 = vpop.permute.xlu0 %2050 }
0x1891   : > { %v1908_v58 = vpack.c.bf16 %v1907_v57, %v1907_v57 }
0x1893   : > { %3092 = vmatmul.mubr.msk.bf16.vlgmr.msra.gmra.mrb[24].mxu0 %vm776_vm3, %v1908_v58 }
0x1894   : > { %3102 = vmatpush3.bf16.msra.mxu0 %v2008_v60  ;;  %3103 = vmatprep.mubr.msk.bf16.mxu0 %vm3392_vm0, %v3393_v14 }
0x1895   : > { %3113 = vmatprep.subr.bf16.mxu0 %v3393_v14 }
0x189b   : > { %3104 = vmatmul.mubr.msk.bf16.vlgmr.msra.gmra.mrb[28].mxu0 %vm776_vm3, %v1846_v61 }
0x189c   : > { %3115 = vmatprep.mubr.msk.bf16.mxu0 %vm3392_vm0, %v3393_v14 }
0x1966   : > { %v1951_v63 = vpop.f32.mrb[24].mxu0 }
0x1967   : > { %v1957_v0 = vpack.c.bf16 %v1951_v63, %v1951_v63  ;;  %v3093_v2 = vpop.f32.mrb[25].mxu0 }
0x1968   : > { %v1954_v3 = vpop.f32.mrb[26].mxu0 }
0x1969   : > { %v3094_v5 = vpop.f32.mrb[27].mxu0  ;;  %3098 = vmatmul.mubr.msk.bf16.vlgmr.msra.gmra.mrb[56].mxu1 %vm776_vm3, %v1957_v0 }
0x196a   : > { %3108 = vmatpush3.bf16.xpose.msra.mxu1 %v2058_v4  ;;  %3109 = vmatprep.mubr.msk.bf16.mxu1 %vm3392_vm0, %v3393_v14 }
0x196b   : > { %3119 = vmatprep.subr.bf16.mxu1 %v3393_v14 }
0x196e   : > { %v2044_v6 = vpop.f32.mrb[28].mxu0 }
0x196f   : > { %v3105_v7 = vpop.f32.mrb[29].mxu0 }
0x1970   : > { %v2047_v9 = vpop.f32.mrb[30].mxu0 }
0x1971   : > { %v3106_v11 = vpop.f32.mrb[31].mxu0  ;;  %3110 = vmatmul.mubr.msk.bf16.vlgmr.msra.gmra.mrb[60].mxu1 %vm776_vm3, %v2051_v8 }
0x1972   : > { %3121 = vmatprep.mubr.msk.bf16.mxu1 %vm3392_vm0, %v3393_v14  ;;  %3120 = vmatpush3.bf16.msra.mxu1 %v2165_v39  ;;  %v2800_v39 = vld [vmem:[%s4091_s12 + $0x1] ss:$0 sm:$0xff] }
0x1973   : > { %3131 = vmatprep.subr.bf16.mxu1 %v3393_v14 }
0x1a3c   : > { %v1998_v12 = vpop.f32.mrb[56].mxu1 }
0x1a3d   : > { %v3908_v13 = vadd.f32 %v2044_v6, %v1998_v12  ;;  %v3099_v15 = vpop.f32.mrb[57].mxu1 }
0x1a3e   : > { %v2001_v34 = vpop.f32.mrb[58].mxu1  ;;  %v2798_v15 = vld [vmem:[%s4087_s8 + $0x1] ss:$0 sm:$0xff] }
0x1a3f   : > { %v3100_v16 = vpop.f32.mrb[59].mxu1 }
0x1a44   : > { %v2094_v17 = vpop.f32.mrb[60].mxu1 }
0x1a45   : > { %v2095_v18 = vadd.f32 %v2094_v17, %v3646_v1  ;;  %v3111_v19 = vpop.f32.mrb[61].mxu1 }
0x1a46   : > { %v2097_v20 = vpop.f32.mrb[62].mxu1 }
0x1a47   : > { %v3112_v21 = vpop.f32.mrb[63].mxu1  ;;  %v2100_v22 = vsel %vm776_vm3, %v2095_v18, -inf }
0x1a48   : > { %2101 = vmax.xlane.f32.xlu1 %v2100_v22 }
0x1a59   : > { %2112 = vrot.lane.b32.xlu1 %v3844_v10, %s4125_s0  ;;  %s2643_s0 = sshll.u32 %s539_s19, 4  ;;  %s4039_s0 = int_to_ptr.vmem [resolvable:$true] %s2643_s0 }
0x1a5a   : > { %s3326_s28 = scalar_lea.vmem %s4039_s0, 128 }
0x1a5b   : > { %p3327_p11 = scmp.ne.s32.totalorder %s4039_s0, %s3326_s28 }
0x1a5d   : > { %2210 = vrot.lane.b32.xlu1 %v3844_v10, %s4126_s20  ;;  %p3328_p12 = pnand %p3327_p11, %p3536_p5 }
0x1a5f   : > { %p3329_p13 = pneg %p3328_p12 }
0x1a61   : > { %2208 = vrot.lane.b32.xlu1 %v3844_v10, %s4127_s21 }
0x1ad5   : > { %v2102_v23 = vpop.xlane.xlu1 %2101 }
0x1ad6   : > { %v2103_v24 = vsub.f32 %v2095_v18, %v2102_v23 }
0x1ad8   : > { %v2104_v25 = vmul.f32 1.442695, %v2103_v24 }
0x1ad9   : > { %v2113_v26 = vpop.permute.xlu1 %2112 }
0x1ada   : > { %3316 = vpow2.f32 %v2104_v25  ;;  %v2118_v27 = vsel %vm840_vm5, %v2113_v26, 0  ;;  %v3274_v25 = vld [vmem:[%s4092_s13 + $0x10] sm:$0xff]   ;;  %v3276_v26 = vld [vmem:[%s4094_s15 + $0x40] sm:$0xff]  }
0x1adb   : > { %3114 = vmatpush3.bf16.msra.mxu0 %v2118_v27  ;;  %v3277_v27 = vld [vmem:[%s4094_s15 + $0x48] sm:$0xff]  }
0x1adc   : > { %3125 = vmatprep.subr.bf16.mxu0 %v3393_v14 }
0x1add   : > { %v2211_v33 = vpop.permute.xlu1 %2210 }
0x1ade   : > { %v2216_v36 = vsel %vm776_vm3, %v2211_v33, 0 }
0x1ae1   : > { %v2209_v37 = vpop.permute.xlu1 %2208 }
0x1ae4   : > { %v3317_v28 = vpop.eup %3316 }
0x1ae5   : > { %v2106_v29 = vsel %vm776_vm3, %v3317_v28, 0.0 }
0x1ae6   : > { %2107 = vadd.xlane.f32.xlu0 %v2106_v29  ;;  %v3279_v29 = vld [vmem:[%s4094_s15 + $0x58] sm:$0xff]  }
0x1b73   : > { %v2108_v30 = vpop.xlane.xlu0 %2107 }
0x1b74   : > { %3318 = vrcp.f32 %v2108_v30  ;;  %v3280_v30 = vld [vmem:[%s4094_s15 + $0x60] sm:$0xff]  }
0x1b7e   : > { %v3319_v31 = vpop.eup %3318 }
0x1b7f   : > { %v2110_v32 = vmul.f32 %v3319_v31, %v3317_v28  ;;  %v3278_v28 = vld [vmem:[%s4094_s15 + $0x50] sm:$0xff]   ;;  %v3281_v31 = vld [vmem:[%s4094_s15 + $0x68] sm:$0xff]  }
0x1b81   : > { %v2111_v35 = vpack.c.bf16 %v2110_v32, %v2110_v32 }
0x1b83   : > { %3116 = vmatmul.mubr.msk.bf16.vlgmr.msra.gmra.mrb[32].mxu0 %vm776_vm3, %v2111_v35 }
0x1b84   : > { %3126 = vmatpush3.bf16.xpose.msra.mxu0 %v2216_v36  ;;  %3127 = vmatprep.mubr.msk.bf16.mxu0 %vm3392_vm0, %v3393_v14 }
0x1b85   : > { %3137 = vmatprep.subr.bf16.mxu0 %v3393_v14 }
0x1b8b   : > { %3128 = vmatmul.mubr.msk.bf16.vlgmr.msra.gmra.mrb[36].mxu0 %vm776_vm3, %v2209_v37  ;;  %v2799_v37 = vld [vmem:[%s4090_s11 + $0x1] ss:$0 sm:$0xff] }
0x1b8c   : > { %3139 = vmatprep.mubr.msk.bf16.mxu0 %vm3392_vm0, %v3393_v14 }
0x1c56   : > { %v2154_v40 = vpop.f32.mrb[32].mxu0 }
0x1c57   : > { %v2160_v41 = vpack.c.bf16 %v2154_v40, %v2154_v40  ;;  %v3117_v42 = vpop.f32.mrb[33].mxu0 }
0x1c58   : > { %v2157_v43 = vpop.f32.mrb[34].mxu0 }
0x1c59   : > { %v3118_v44 = vpop.f32.mrb[35].mxu0  ;;  %3122 = vmatmul.mubr.msk.bf16.vlgmr.msra.gmra.mrb[64].mxu1 %vm776_vm3, %v2160_v41  ;;  %v3282_v43 = vld [vmem:[%s4094_s15 + $0x70] sm:$0xff]  }
0x1c5a   : > { %3133 = vmatprep.mubr.msk.bf16.mxu1 %vm3392_vm0, %v3393_v14  ;;  %v3283_v44 = vld [vmem:[%s4094_s15 + $0x78] sm:$0xff]  }
0x1c5e   : > { %v2252_v45 = vpop.f32.mrb[36].mxu0 }
0x1c5f   : > { %v2253_v46 = vadd.f32 %v2252_v45, %v3646_v1  ;;  %v3129_v47 = vpop.f32.mrb[37].mxu0  ;;  %v2752_v1 = vld [vmem:[%s4086_s7 + $0x1c] sm:$0xf]  ;;  %v2801_v45 = vld [vmem:[%s4093_s14 + $0x1] ss:$0 sm:$0xff] }
0x1c60   : > { %v2255_v48 = vpop.f32.mrb[38].mxu0  ;;  %v2323_v56 = vsel %vm840_vm5, %v2752_v1, 0 }
0x1c61   : > { %v3130_v49 = vpop.f32.mrb[39].mxu0  ;;  %v2258_v50 = vsel %vm776_vm3, %v2253_v46, -inf  ;;  %3138 = vmatpush3.bf16.msra.mxu0 %v2323_v56 }
0x1c62   : > { %2259 = vmax.xlane.f32.xlu1 %v2258_v50  ;;  %3151 = vmatprep.subr.bf16.mxu0 %v3393_v14 }
0x1cef   : > { %v2260_v51 = vpop.xlane.xlu1 %2259 }
0x1cf0   : > { %v2261_v52 = vsub.f32 %v2253_v46, %v2260_v51 }
0x1cf2   : > { %v2262_v53 = vmul.f32 1.442695, %v2261_v52 }
0x1cf4   : > { %3320 = vpow2.f32 %v2262_v53  ;;  %v3284_v53 = vld [vmem:[%s4082_s3] sm:$0xff]  }
0x1cfe   : > { %v3321_v54 = vpop.eup %3320 }
0x1cff   : > { %v2264_v55 = vsel %vm776_vm3, %v3321_v54, 0.0 }
0x1d00   : > { %2265 = vadd.xlane.f32.xlu0 %v2264_v55  ;;  %v2813_v55 = vld [vmem:[%s4095_s16 + $0x1] ss:$0 sm:$0xff] }
0x1d16   : > { %2270 = vrot.lane.b32.xlu0 %v3844_v10, %s4128_s29  ;;  %s3407_s29 = smov [#allocation2]  }
0x1d17   : > { %s3330_s18 = sshll.u32 %s3407_s29, 4  ;;  %s3331_s18 = int_to_ptr.vmem [resolvable:$false] %s3330_s18 }
0x1d18   : > { %s3332_s26 = scalar_lea.vmem %s3331_s18, 256  ;;  %p3333_p0 = scmp.lt.s32.totalorder %s4039_s0, %s3331_s18 }
0x1d19   : > { %p3334_p1 = scmp.lt.s32.totalorder %s3332_s26, %s3326_s28 }
0x1d1b   : > { %p3335_p2 = por %p3334_p1, %p3333_p0 }
0x1d1d   : > { %p3336_p3 = pnand %p3335_p2, %p3329_p13 }
0x1d2c   : > { %v2201_v57 = vpop.f32.mrb[64].mxu1 }
0x1d2d   : > { %v2207_v58 = vadd.f32 %v2201_v57, %v3908_v13  ;;  %v3123_v60 = vpop.f32.mrb[65].mxu1 }
0x1d2e   : > { %v2204_v61 = vpop.f32.mrb[66].mxu1 }
0x1d2f   : > { %v3124_v62 = vpop.f32.mrb[67].mxu1 }
0x1d8d   : > { %v2266_v63 = vpop.xlane.xlu0 %2265 }
0x1d8e   : > { %3322 = vrcp.f32 %v2266_v63 }
0x1d91   : > { %v2271_v0 = vpop.permute.xlu0 %2270 }
0x1d92   : > { %v2276_v10 = vsel %vm840_vm5, %v2271_v0, 0 }
0x1d93   : > { %3132 = vmatpush3.bf16.msra.mxu1 %v2276_v10 }
0x1d94   : > { %3143 = vmatprep.subr.bf16.mxu1 %v3393_v14 }
0x1d98   : > { %v3323_v2 = vpop.eup %3322 }
0x1d99   : > { %v2268_v3 = vmul.f32 %v3323_v2, %v3321_v54  ;;  %v3285_v54 = vld [vmem:[%s4082_s3 + $0x8] sm:$0xff]  }
0x1d9b   : > { %v2269_v4 = vpack.c.bf16 %v2268_v3, %v2268_v3 }
0x1d9d   : > { %3134 = vmatmul.mubr.msk.bf16.vlgmr.msra.gmra.mrb[68].mxu1 %vm776_vm3, %v2269_v4 }
0x1d9e   : > { %3147 = vmatprep.mubr.msk.bf16.mxu1 %vm3392_vm0, %v3393_v14  ;;  %3144 = vmatpush3.bf16.msra.mxu1 %v3274_v25 }
0x1d9f   : > { %3145 = vmatprep.subr.bf16.mxu1 %v3393_v14 }
0x1e70   : > { %v2312_v5 = vpop.f32.mrb[68].mxu1 }
0x1e71   : > { %v2318_v6 = vpack.c.bf16 %v2312_v5, %v2312_v5  ;;  %v3135_v7 = vpop.f32.mrb[69].mxu1 }
0x1e72   : > { %v2315_v8 = vpop.f32.mrb[70].mxu1 }
0x1e73   : > { %v3136_v9 = vpop.f32.mrb[71].mxu1  ;;  %3140 = vmatmul.mubr.msk.bf16.vlgmr.msra.gmra.mrb[40].mxu0 %vm776_vm3, %v2318_v6 }
0x1e74   : > { %3167 = vmatprep.mubr.msk.bf16.mxu0 %vm3392_vm0, %v3393_v14  ;;  %3152 = vmatpush3.bf16.msra.mxu0 %v3276_v26 }
0x1e75   : > { %3153 = vmatprep.subr.bf16.mxu0 %v3393_v14 }
0x1e78   : > { %3154 = vmatpush3.bf16.msra.mxu0 %v3277_v27 }
0x1e79   : > { %3155 = vmatprep.subr.bf16.mxu0 %v3393_v14 }
0x1e7c   : > { %3156 = vmatpush3.bf16.msra.mxu0 %v3278_v28 }
0x1e7d   : > { %3157 = vmatprep.subr.bf16.mxu0 %v3393_v14 }
0x1e80   : > { %3158 = vmatpush3.bf16.msra.mxu0 %v3279_v29 }
0x1e81   : > { %3159 = vmatprep.subr.bf16.mxu0 %v3393_v14 }
0x1e84   : > { %3160 = vmatpush3.bf16.msra.mxu0 %v3280_v30 }
0x1e85   : > { %3161 = vmatprep.subr.bf16.mxu0 %v3393_v14 }
0x1e88   : > { %3162 = vmatpush3.bf16.msra.mxu0 %v3281_v31 }
0x1e89   : > { %3163 = vmatprep.subr.bf16.mxu0 %v3393_v14 }
0x1e8c   : > { %3164 = vmatpush3.bf16.msra.mxu0 %v3282_v43 }
0x1e8d   : > { %3165 = vmatprep.subr.bf16.mxu0 %v3393_v14 }
0x1e90   : > { %3166 = vmatpush3.bf16.msra.mxu0 %v3283_v44 }
0x1f46   : > { %v2359_v11 = vpop.f32.mrb[40].mxu0 }
0x1f47   : > { %v2365_v12 = vadd.f32 %v2359_v11, %v2207_v58  ;;  %v3141_v13 = vpop.f32.mrb[41].mxu0 }
0x1f48   : > { %v2362_v34 = vpop.f32.mrb[42].mxu0 }
0x1f49   : > { %v2366_v16 = vadd.f32 %v2365_v12, %v3818_v59  ;;  %v3142_v17 = vpop.f32.mrb[43].mxu0  ;;  %v3275_v59 = vld [vmem:[%s4092_s13 + $0x18] sm:$0xff]  }
0x1f4a   : > { %3146 = vmatpush3.bf16.msra.mxu1 %v3275_v59 }
0x1f4b   : > { %v3960_v18 = vadd.f32 %v2798_v15, %v2366_v16  ;;  %3171 = vmatprep.subr.bf16.mxu1 %v3393_v14 }
0x1f4d   : > { %v2374_v19 = vsel %vm681_vm2, %v3960_v18, 0.0 }
0x1f4e   : > { %2375 = vadd.xlane.f32.xlu0 %v2374_v19 }
0x1fdb   : > { %v2376_v20 = vpop.xlane.xlu0 %2375 }
0x1fdc   : > { %v2377_v21 = vmul.f32 0.03125, %v2376_v20 }
0x1fde   : > { %v2378_v22 = vsub.f32 %v3960_v18, %v2377_v21 }
0x1fe0   : > { %v2379_v23 = vmul.f32 %v2378_v22, %v2378_v22 }
0x1fe2   : > { %v2380_v24 = vsel %vm681_vm2, %v2379_v23, 0.0 }
0x1fe3   : > { %2381 = vadd.xlane.f32.xlu1 %v2380_v24 }
0x2070   : > { %v2382_v32 = vpop.xlane.xlu1 %2381 }
0x2071   : > { %v2383_v33 = vmul.f32 0.03125, %v2382_v32 }
0x2073   : > { %v2384_v35 = vadd.f32 1e-05, %v2383_v33 }
0x2075   : > { %3324 = vrsqrt.f32 %v2384_v35 }
0x207f   : > { %v3325_v36 = vpop.eup %3324 }
0x2080   : > { %v2386_v38 = vmul.f32 %v3325_v36, %v2378_v22 }
0x2082   : > { %v2393_v40 = vmul.f32 %v2799_v37, %v2386_v38 }
0x2084   : > { %v2400_v41 = vadd.f32 %v2800_v39, %v2393_v40 }
0x2086   : > { %v2401_v42 = vpack.c.bf16 %v2400_v41, %v2400_v41 }
0x2088   : > { %3148 = vmatmul.mubr.msk.bf16.vlgmr.msra.gmra.mrb[72].mxu1 %vm681_vm2, %v2401_v42 }
0x2089   : > { %3175 = vmatprep.mubr.msk.bf16.mxu1 %vm3392_vm0, %v3393_v14  ;;  %3172 = vmatpush3.bf16.msra.mxu1 %v3284_v53 }
0x208a   : > { %3173 = vmatprep.subr.bf16.mxu1 %v3393_v14  ;;  %v2814_v14 = vld [vmem:[%s4083_s4] ss:$0 sm:$0xff] }
0x208d   : > { %3174 = vmatpush3.bf16.msra.mxu1 %v3285_v54 }
0x215b   : > { %v2457_v46 = vpop.f32.mrb[72].mxu1 }
0x215c   : > { %v2458_v47 = vadd.f32 %v2801_v45, %v2457_v46  ;;  %v3149_v48 = vpop.f32.mrb[73].mxu1 }
0x215d   : > { %v2460_v49 = vpop.f32.mrb[74].mxu1 }
0x215e   : > { %v2463_v50 = vmax.f32 %v2458_v47, 0.0  ;;  %v3150_v51 = vpop.f32.mrb[75].mxu1 }
0x2160   : > { %v2464_v52 = vpack.c.bf16 %v2463_v50, %v2463_v50 }
0x2162   : > { %3168 = vmatmul.mubr.bf16.vlgmr.msra.gmra.mrb[44].mxu0 %v2464_v52 }
0x2235   : > { %v2547_v1 = vpop.f32.mrb[44].mxu0 }
0x2236   : > { %v2553_v56 = vadd.f32 %v2547_v1, %v3960_v18  ;;  %v3169_v57 = vpop.f32.mrb[45].mxu0 }
0x2237   : > { %v2550_v58 = vpop.f32.mrb[46].mxu0 }
0x2238   : > { %v2560_v60 = vadd.f32 %v2813_v55, %v2553_v56  ;;  %v3170_v61 = vpop.f32.mrb[47].mxu0 }
0x223a   : > { %v2561_v62 = vpack.c.bf16 %v2560_v60, %v2560_v60 }
0x223c   : > { %3176 = vmatmul.mubr.msk.bf16.vlgmr.msra.gmra.mrb[76].mxu1 %vm681_vm2, %v2561_v62 }
0x230f   : > { %v2622_v63 = vpop.f32.mrb[76].mxu1 }
0x2310   : > { %v2623_v0 = vadd.f32 %v2814_v14, %v2622_v63  ;;  %v3177_v10 = vpop.f32.mrb[77].mxu1 }
0x2311   : > { %v2625_v2 = vpop.f32.mrb[78].mxu1 }
0x2312   : > { %2628 = vst [vmem:[%s539_s19] sm:$0xff] %v2623_v0  ;;  %v3178_v3 = vpop.f32.mrb[79].mxu1 }
0x2313   : > { %3339 = shalt.err (!%p3336_p3)
}
0x2314   : > { %s3340_s30 = scalar_lea.hbm %s4037_s24, 128  ;;  %s3344_s19 = scalar_lea.hbm %s4096_s17, 256 }
0x2315   : > { %p3341_p4 = scmp.ne.s32.totalorder %s4037_s24, %s3340_s30  ;;  %p3345_p9 = scmp.lt.u32.totalorder %s4037_s24, %s4096_s17 }
0x2316   : > { %p3346_p10 = scmp.lt.u32.totalorder %s3344_s19, %s3340_s30  ;;  %p3348_p12 = scmp.lt.u32.totalorder %s3340_s30, %s4037_s24 }
0x2317   : > { %p3342_p7 = pnand %p3341_p4, %p3536_p5 }
0x2318   : > { %p3347_p11 = por %p3346_p10, %p3345_p9 }
0x2319   : > { %p3343_p8 = pneg %p3342_p7 }
0x231a   : > { %p3349_p13 = por %p3348_p12, %p3347_p11 }
0x231c   : > { %p3350_p0 = pnand %p3349_p13, %p3343_p8 }
0x231e   : > { %3353 = shalt.err (!%p3350_p0)
}
0x231f   : > { %3203 = dma.vmem_to_hbm [thread:$0]  (%p3536_p5), %s4039_s0, 128, %s4037_s24, %s2630_s22  }
0x2320 PF: > { %s4129_s28 = sld [smem:[#allocation7_spill]]  ;;  %s4130_s29 = sld [smem:[#allocation5_spill]] }
0x2326   : > { %p3209_p1 = scmp.ge.s32.totalorder %s4129_s28, 2  ;;  %s2655_s26 = sand.u32 1, %s4130_s29  }
0x2327   : > { %s2656_s27 = scalar_lea.sflag [#allocation3], %s2655_s26 }
0x2328   : > { %p3206_p2 = pnand %p3209_p1, %p3540_p6 }
0x232a   : > { %3371 = dma.done.wait (!%p3206_p2), %s2656_s27, 128  }
0x232b   : > { %3373 = vsyncadd (!%p3206_p2), %s2656_s27, 4294967168  ;;  %s4132_s27 = sld [smem:[#allocation8_spill]]  ;;  %s4133_s30 = sld [smem:[#allocation6_spill]] }
0x232c   : > { %s4134_s26 = sld [smem:[#allocation9_spill]]  ;;  %s4135_s24 = smov %s3380_s25 }
0x2331   : > { %p27_p3 = scmp.ge.s32.totalorder %s4132_s27, 4   ;;  %s4136_s25 = smov %s4133_s30 }
0x2333   :  { %29 = sbr.rel (!%p27_p3) target bundleno = 6 (0x6), region = 135 }
0x233a   :  { %2661 = vsyncpa [#allocation3], 1 }
0x233b   :  { %2663 = vsyncpa [#allocation3 + $0x1], 1 }

</bundles_post_ra>
